<compile_context>
chip_gen: v7x
topology: tpu7x:2x2x1
jax: 0.10.0
libtpu: 0.0.40
codegen_flags: <defaults>
</compile_context>

<pallas_src>
import math

import jax
import jax.numpy as jnp
from jax import lax
from jax.experimental import pallas as pl
from jax.experimental.pallas import tpu as pltpu


# -----------------------------------------------------------------------------
# Pallas kernel: flash self-attention (1 head, d_head == C) + out-proj + residual
# -----------------------------------------------------------------------------
def _attn_block_kernel(xq_ref, xkv_ref, wq_ref, wk_ref, wv_ref, wo_ref,
                       bq_ref, bk_ref, bv_ref, bo_ref, o_ref,
                       q_sc, k_cache, v_cache, m_sc, l_sc, acc_sc):
    # xq_ref  : (1, C, tq) channel-major activation tile (f32) — Q side + residual
    # xkv_ref : (1, C, tk) channel-major activation tile (f32) — K/V fill pass only
    # wq_ref  : (C, C) = Wq^T * (1/sqrt(C))  (bf16)   q_tok  = x_tok @ wq_ref
    # wk/wv   : (C, C) = Wk, Wv (bf16)                k_cm   = Wk @ x_cm
    # wo_ref  : (C, C) = Wo (bf16)                    out_cm = Wo @ attn_tok^T
    # bq_ref  : (1, C) f32 (pre-scaled) ; bk/bv/bo : (C, 1) f32
    # o_ref   : (1, C, tq)
    # k_cache/v_cache : (C, S) bf16 persistent VMEM scratch (projected K / V)
    qi = pl.program_id(1)
    ki = pl.program_id(2)
    tk = xkv_ref.shape[2]
    start = pl.multiple_of(ki * tk, tk)

    @pl.when(ki == 0)
    def _init_q():
        m_sc[...] = jnp.full_like(m_sc, -jnp.inf)
        l_sc[...] = jnp.zeros_like(l_sc)
        acc_sc[...] = jnp.zeros_like(acc_sc)
        # One (C, tq) -> (tq, C) transpose per Q tile (XLU), amortized over all ki.
        x_tok = xq_ref[0].T.astype(jnp.bfloat16)                       # (tq, C)
        q = jnp.dot(x_tok, wq_ref[...], preferred_element_type=jnp.float32)
        q_sc[...] = (q + bq_ref[...]).astype(jnp.bfloat16)             # scale pre-folded

    # Fill the projected-K/V VMEM cache once per batch (first Q-tile pass only);
    # all later Q tiles reuse it — no repeated Wk/Wv matmuls, no x re-stream.
    @pl.when(qi == 0)
    def _fill_kv_cache():
        x_kv = xkv_ref[0].astype(jnp.bfloat16)                         # (C, tk)
        k_bf = (jnp.dot(wk_ref[...], x_kv, preferred_element_type=jnp.float32)
                + bk_ref[...]).astype(jnp.bfloat16)
        v_bf = (jnp.dot(wv_ref[...], x_kv, preferred_element_type=jnp.float32)
                + bv_ref[...]).astype(jnp.bfloat16)
        k_cache[:, pl.ds(start, tk)] = k_bf
        v_cache[:, pl.ds(start, tk)] = v_bf

    k_bf = k_cache[:, pl.ds(start, tk)]                                # (C, tk) bf16
    v_bf = v_cache[:, pl.ds(start, tk)]                                # (C, tk) bf16

    # ---- scores: (tq, C) @ (C, tk) — plain NN matmul, no K transpose ----
    s = jnp.dot(q_sc[...], k_bf, preferred_element_type=jnp.float32)   # (tq, tk) f32

    # ---- online softmax (f32) ----
    m_prev = m_sc[...]
    m_new = jnp.maximum(m_prev, jnp.max(s, axis=-1, keepdims=True))
    alpha = jnp.exp(m_prev - m_new)
    p = jnp.exp(s - m_new)
    l_sc[...] = alpha * l_sc[...] + jnp.sum(p, axis=-1, keepdims=True)
    # p @ v_tok expressed as an NT dot_general against channel-major V (no transpose).
    pv = lax.dot_general(p.astype(jnp.bfloat16), v_bf,
                         (((1,), (1,)), ((), ())),
                         preferred_element_type=jnp.float32)           # (tq, C)
    acc_sc[...] = alpha * acc_sc[...] + pv
    m_sc[...] = m_new

    # ---- finalize: out-proj + residual, written back channel-major (lane-dense) ----
    @pl.when(ki == pl.num_programs(2) - 1)
    def _finalize():
        inv_l = pl.reciprocal(l_sc[...], approx=True)                  # EUP slot, ~free
        attn = (acc_sc[...] * inv_l).astype(jnp.bfloat16)              # (tq, C)
        # out_cm[o, i] = sum_c Wo[o, c] * attn[i, c]   (NT dot_general, no transpose)
        out_cm = lax.dot_general(wo_ref[...], attn,
                                 (((1,), (1,)), ((), ())),
                                 preferred_element_type=jnp.float32)   # (C, tq)
        out_cm = out_cm + bo_ref[...] + xq_ref[0]                      # + bias + residual
        o_ref[0] = out_cm.astype(o_ref.dtype)


def _default_vmem_limit_bytes(c, s, tq, tk):
    cache = 2 * c * s * 2                               # bf16 K/V VMEM caches
    weights = 4 * c * c * 2 + 8 * c * 4                 # single-buffered W + biases
    scratch = tq * c * 2 + tq * c * 4 + 2 * tq * 4      # q_sc + acc + (m, l)
    io_tiles = 2 * c * tq * 4 * 2 + 2 * c * tk * 4      # double-buffered xq / out / xkv
    staging = 3 * tq * tk * 4 + 4 * c * tk * 2          # score/prob + k/v values
    est = cache + weights + scratch + io_tiles + staging
    # Floor 32 MiB, cap 96 MiB (v5e/v6e have 128 MiB physical; on v7x pass a
    # smaller explicit limit / smaller tiles for very large S — see TODO above).
    return int(min(max(est + (16 << 20), 32 << 20), 96 << 20))


def vae_attention_block(x_nchw, params, *, block_q=512, block_kv=512,
                        vmem_limit_bytes=None):
    """VAE_AttentionBlock forward.  x_nchw: (N, C, H, W) f32 -> (N, C, H, W)."""
    n, c, h, w = x_nchw.shape
    s = h * w
    tq = min(block_q, s)
    tk = min(block_kv, s)
    if s % tq or s % tk:
        raise ValueError(f"seq len {s} must be divisible by tiles ({tq}, {tk})")
    if vmem_limit_bytes is None:
        vmem_limit_bytes = _default_vmem_limit_bytes(c, s, tq, tk)

    # Free reshape only — the kernel consumes/produces channel-major (N, C, S)
    # tiles directly, so XLA emits no HBM transpose pass on either side.
    x_csr = x_nchw.reshape(n, c, s)

    scale = 1.0 / math.sqrt(c)
    w_in = params["in_proj_w"]
    b_in = params["in_proj_b"]
    # Split fused in_proj into per-Q/K/V (C, C) blocks; bf16 weights (MXU operands),
    # f32 biases.  The 1/sqrt(C) softmax scale is folded into Wq / bq here.
    wq_t = jnp.asarray(w_in[0 * c:1 * c, :].T * scale, jnp.bfloat16)   # (C, C) = Wq^T*s
    wk = jnp.asarray(w_in[1 * c:2 * c, :], jnp.bfloat16)               # (C, C)
    wv = jnp.asarray(w_in[2 * c:3 * c, :], jnp.bfloat16)               # (C, C)
    wo = jnp.asarray(params["out_proj_w"], jnp.bfloat16)               # (C, C)
    bq = (b_in[0 * c:1 * c] * scale).reshape(1, c).astype(jnp.float32)
    bk = b_in[1 * c:2 * c].reshape(c, 1).astype(jnp.float32)
    bv = b_in[2 * c:3 * c].reshape(c, 1).astype(jnp.float32)
    bo = params["out_proj_b"].reshape(c, 1).astype(jnp.float32)

    const = lambda b, qi, ki: (0, 0)
    single = pl.Buffered(1)   # constant index_map => single-buffer (save VMEM)

    def xq_map(b, qi, ki):
        return (b, 0, qi)

    def xkv_map(b, qi, ki):
        # Only the qi == 0 pass reads fresh x tiles on the K/V side (it fills
        # the VMEM K/V cache); afterwards keep the block index constant so the
        # pipeline skips the redundant HBM DMAs.
        return (b, 0, jnp.where(qi == 0, ki, 0))

    out_csr = pl.pallas_call(
        _attn_block_kernel,
        out_shape=jax.ShapeDtypeStruct((n, c, s), x_csr.dtype),
        grid_spec=pltpu.PrefetchScalarGridSpec(
            num_scalar_prefetch=0,
            grid=(n, s // tq, s // tk),
            in_specs=[
                pl.BlockSpec((1, c, tq), xq_map),                        # x (Q + residual)
                pl.BlockSpec((1, c, tk), xkv_map),                       # x (K/V fill pass)
                pl.BlockSpec((c, c), const, pipeline_mode=single),       # Wq^T * scale
                pl.BlockSpec((c, c), const, pipeline_mode=single),       # Wk
                pl.BlockSpec((c, c), const, pipeline_mode=single),       # Wv
                pl.BlockSpec((c, c), const, pipeline_mode=single),       # Wo
                pl.BlockSpec((1, c), const, pipeline_mode=single),       # bq * scale
                pl.BlockSpec((c, 1), const, pipeline_mode=single),       # bk
                pl.BlockSpec((c, 1), const, pipeline_mode=single),       # bv
                pl.BlockSpec((c, 1), const, pipeline_mode=single),       # bo
            ],
            out_specs=pl.BlockSpec((1, c, tq), xq_map),
            scratch_shapes=[
                pltpu.VMEM((tq, c), jnp.bfloat16),   # scaled Q tile
                pltpu.VMEM((c, s), jnp.bfloat16),    # projected K cache (persistent)
                pltpu.VMEM((c, s), jnp.bfloat16),    # projected V cache (persistent)
                pltpu.VMEM((tq, 1), jnp.float32),    # running max m
                pltpu.VMEM((tq, 1), jnp.float32),    # running sum l
                pltpu.VMEM((tq, c), jnp.float32),    # output accumulator
            ],
        ),
        compiler_params=pltpu.CompilerParams(
            # Batch "parallel" (megacore); qi "arbitrary" so the qi==0 K/V-cache
            # fill is sequenced before the qi>0 tiles on each core; ki reduction.
            dimension_semantics=("parallel", "arbitrary", "arbitrary"),
            vmem_limit_bytes=vmem_limit_bytes,
        ),
    )(x_csr, x_csr, wq_t, wk, wv, wo, bq, bk, bv, bo)

    return out_csr.reshape(n, c, h, w)


# -----------------------------------------------------------------------------
# Deterministic parameter init (PyTorch nn.Linear default: U(-1/sqrt(fan_in), +))
# -----------------------------------------------------------------------------
def init_params(key, channels):
    ks = jax.random.split(key, 6)
    bound = 1.0 / math.sqrt(channels)
    return {
        # SelfAttention(1, channels)
        "in_proj_w": jax.random.uniform(ks[0], (3 * channels, channels),
                                        jnp.float32, -bound, bound),
        "in_proj_b": jax.random.uniform(ks[1], (3 * channels,),
                                        jnp.float32, -bound, bound),
        "out_proj_w": jax.random.uniform(ks[2], (channels, channels),
                                         jnp.float32, -bound, bound),
        "out_proj_b": jax.random.uniform(ks[3], (channels,),
                                         jnp.float32, -bound, bound),
        # GroupNorm(32, channels): declared in __init__ but unused in forward()
        "gn_gamma": jnp.ones((channels,), jnp.float32),
        "gn_beta": jnp.zeros((channels,), jnp.float32),
    }


# -----------------------------------------------------------------------------
# Pure-JAX f32 reference for correctness checking
# -----------------------------------------------------------------------------
def reference(x_nchw, params):
    n, c, h, w = x_nchw.shape
    x = jnp.transpose(x_nchw.reshape(n, c, h * w), (0, 2, 1))   # (N, S, C)
    qkv = x @ params["in_proj_w"].T + params["in_proj_b"]
    q, k, v = jnp.split(qkv, 3, axis=-1)
    scores = (q @ jnp.swapaxes(k, -1, -2)) / math.sqrt(c)
    p = jax.nn.softmax(scores, axis=-1)
    attn = p @ v
    out = attn @ params["out_proj_w"].T + params["out_proj_b"]
    out = out + x
    return jnp.transpose(out, (0, 2, 1)).reshape(n, c, h, w)


if __name__ == "__main__":
    # channels must be a multiple of 32 (GroupNorm(32, channels) in __init__)
    N, C, H, W = 2, 32, 16, 16          # S = 256 -> 2 Q tiles x 2 K/V tiles
    key = jax.random.PRNGKey(0)
    kx, kp = jax.random.split(key)

    x = jax.random.normal(kx, (N, C, H, W), jnp.float32)
    params = init_params(kp, C)

    # Small tiles so the multi-tile paths (K/V-cache reuse at qi>0, online
    # softmax across ki) are exercised at toy shapes.
    out = vae_attention_block(x, params, block_q=128, block_kv=128)
    out = jax.block_until_ready(out)

    ref = reference(x, params)
    assert out.shape == (N, C, H, W)
    err = float(jnp.max(jnp.abs(out - ref)))
    # bf16 MXU operands (f32 accumulation) => slightly looser tolerance than pure f32.
    assert jnp.allclose(out, ref, atol=3e-2, rtol=3e-2), \
        f"mismatch vs reference (max abs err {err})"

    print("KERNEL_OK")
</pallas_src>

<mosaic_0001>
module attributes {stable_mosaic.version = 11 : i64} {
  func.func @_attn_block_kernel(%arg0: i32, %arg1: i32, %arg2: i32, %arg3: memref<1x32x128xf32, #tpu.memory_space<vmem>>, %arg4: memref<1x32x128xf32, #tpu.memory_space<vmem>>, %arg5: memref<32x32xbf16, #tpu.memory_space<vmem>>, %arg6: memref<32x32xbf16, #tpu.memory_space<vmem>>, %arg7: memref<32x32xbf16, #tpu.memory_space<vmem>>, %arg8: memref<32x32xbf16, #tpu.memory_space<vmem>>, %arg9: memref<1x32xf32, #tpu.memory_space<vmem>>, %arg10: memref<32x1xf32, #tpu.memory_space<vmem>>, %arg11: memref<32x1xf32, #tpu.memory_space<vmem>>, %arg12: memref<32x1xf32, #tpu.memory_space<vmem>>, %arg13: memref<1x32x128xf32, #tpu.memory_space<vmem>>, %arg14: memref<128x32xbf16, #tpu.memory_space<vmem>>, %arg15: memref<32x256xbf16, #tpu.memory_space<vmem>>, %arg16: memref<32x256xbf16, #tpu.memory_space<vmem>>, %arg17: memref<128x1xf32, #tpu.memory_space<vmem>>, %arg18: memref<128x1xf32, #tpu.memory_space<vmem>>, %arg19: memref<128x32xf32, #tpu.memory_space<vmem>>) attributes {dimension_semantics = [#tpu.dimension_semantics<parallel>, #tpu.dimension_semantics<arbitrary>, #tpu.dimension_semantics<arbitrary>], iteration_bounds = array<i64: 2, 2, 2>, scalar_prefetch = 0 : i64, scratch_operands = 6 : i64, tpu.core_type = #tpu.core_type<tc>, window_params = [{transform_indices = @transform_0, window_bounds = array<i64: 1, 32, 128>}, {transform_indices = @transform_1, window_bounds = array<i64: 1, 32, 128>}, {pipeline_mode = #tpu.pipeline_mode<synchronous>, transform_indices = @transform_2, window_bounds = array<i64: 32, 32>}, {pipeline_mode = #tpu.pipeline_mode<synchronous>, transform_indices = @transform_3, window_bounds = array<i64: 32, 32>}, {pipeline_mode = #tpu.pipeline_mode<synchronous>, transform_indices = @transform_4, window_bounds = array<i64: 32, 32>}, {pipeline_mode = #tpu.pipeline_mode<synchronous>, transform_indices = @transform_5, window_bounds = array<i64: 32, 32>}, {pipeline_mode = #tpu.pipeline_mode<synchronous>, transform_indices = @transform_6, window_bounds = array<i64: 1, 32>}, {pipeline_mode = #tpu.pipeline_mode<synchronous>, transform_indices = @transform_7, window_bounds = array<i64: 32, 1>}, {pipeline_mode = #tpu.pipeline_mode<synchronous>, transform_indices = @transform_8, window_bounds = array<i64: 32, 1>}, {pipeline_mode = #tpu.pipeline_mode<synchronous>, transform_indices = @transform_9, window_bounds = array<i64: 32, 1>}, {transform_indices = @transform_10, window_bounds = array<i64: 1, 32, 128>}]} {
    %c128_i32 = arith.constant 128 : i32
    %0 = arith.muli %arg2, %c128_i32 : i32
    %1 = tpu.assume_multiple %0, 128 : i32
    %c0_i32 = arith.constant 0 : i32
    %2 = arith.cmpi eq, %arg2, %c0_i32 : i32
    %3 = arith.extui %2 : i1 to i32
    %c0_i32_0 = arith.constant 0 : i32
    %4 = arith.cmpi ne, %3, %c0_i32_0 : i32
    scf.if %4 {
      %cst_22 = arith.constant 0xFF800000 : f32
      %40 = vector.broadcast %cst_22 : f32 to vector<128x1xf32>
      %c0_23 = arith.constant 0 : index
      %c0_24 = arith.constant 0 : index
      %41 = vector.load %arg17[%c0_23, %c0_24] : memref<128x1xf32, #tpu.memory_space<vmem>>, vector<128x1xf32>
      tpu.vector_store %arg17[%c0_23, %c0_24], %40 {strides = array<i32>} : memref<128x1xf32, #tpu.memory_space<vmem>>, vector<128x1xf32>,
      %cst_25 = arith.constant 0.000000e+00 : f32
      %42 = vector.broadcast %cst_25 : f32 to vector<128x1xf32>
      %c0_26 = arith.constant 0 : index
      %c0_27 = arith.constant 0 : index
      %43 = vector.load %arg18[%c0_26, %c0_27] : memref<128x1xf32, #tpu.memory_space<vmem>>, vector<128x1xf32>
      tpu.vector_store %arg18[%c0_26, %c0_27], %42 {strides = array<i32>} : memref<128x1xf32, #tpu.memory_space<vmem>>, vector<128x1xf32>,
      %cst_28 = arith.constant 0.000000e+00 : f32
      %44 = vector.broadcast %cst_28 : f32 to vector<128x32xf32>
      %c0_29 = arith.constant 0 : index
      %c0_30 = arith.constant 0 : index
      %45 = vector.load %arg19[%c0_29, %c0_30] : memref<128x32xf32, #tpu.memory_space<vmem>>, vector<128x32xf32>
      tpu.vector_store %arg19[%c0_29, %c0_30], %44 {strides = array<i32>} : memref<128x32xf32, #tpu.memory_space<vmem>>, vector<128x32xf32>,
      %c0_31 = arith.constant 0 : index
      %c0_32 = arith.constant 0 : index
      %c0_33 = arith.constant 0 : index
      %46 = vector.load %arg3[%c0_31, %c0_32, %c0_33] : memref<1x32x128xf32, #tpu.memory_space<vmem>>, vector<1x32x128xf32>
      %47 = vector.shape_cast %46 : vector<1x32x128xf32> to vector<32x128xf32>
      %48 = tpu.transpose %47, [1, 0] : vector<32x128xf32> -> vector<128x32xf32>
      %49 = arith.truncf %48 : vector<128x32xf32> to vector<128x32xbf16>
      %c0_34 = arith.constant 0 : index
      %c0_35 = arith.constant 0 : index
      %50 = vector.load %arg5[%c0_34, %c0_35] : memref<32x32xbf16, #tpu.memory_space<vmem>>, vector<32x32xbf16>
      %cst_36 = arith.constant dense<0.000000e+00> : vector<128x32xf32>
      %51 = tpu.matmul %49, %50, %cst_36 {dimension_numbers = #tpu.dot_dimension_numbers<[1], [0], [0], [1], [0, 0, 1, 1], [], []>} : vector<128x32xbf16>, vector<32x32xbf16>, vector<128x32xf32> -> vector<128x32xf32>
      %c0_37 = arith.constant 0 : index
      %c0_38 = arith.constant 0 : index
      %52 = vector.load %arg9[%c0_37, %c0_38] : memref<1x32xf32, #tpu.memory_space<vmem>>, vector<1x32xf32>
      %53 = vector.broadcast %52 : vector<1x32xf32> to vector<128x32xf32>
      %54 = arith.addf %51, %53 : vector<128x32xf32>
      %55 = arith.truncf %54 : vector<128x32xf32> to vector<128x32xbf16>
      %c0_39 = arith.constant 0 : index
      %c0_40 = arith.constant 0 : index
      %56 = vector.load %arg14[%c0_39, %c0_40] : memref<128x32xbf16, #tpu.memory_space<vmem>>, vector<128x32xbf16>
      tpu.vector_store %arg14[%c0_39, %c0_40], %55 {strides = array<i32>} : memref<128x32xbf16, #tpu.memory_space<vmem>>, vector<128x32xbf16>,
    } else {
    }
    %c0_i32_1 = arith.constant 0 : i32
    %5 = arith.cmpi eq, %arg1, %c0_i32_1 : i32
    %6 = arith.extui %5 : i1 to i32
    %c0_i32_2 = arith.constant 0 : i32
    %7 = arith.cmpi ne, %6, %c0_i32_2 : i32
    scf.if %7 {
      %c0_22 = arith.constant 0 : index
      %c0_23 = arith.constant 0 : index
      %c0_24 = arith.constant 0 : index
      %40 = vector.load %arg4[%c0_22, %c0_23, %c0_24] : memref<1x32x128xf32, #tpu.memory_space<vmem>>, vector<1x32x128xf32>
      %41 = vector.shape_cast %40 : vector<1x32x128xf32> to vector<32x128xf32>
      %42 = arith.truncf %41 : vector<32x128xf32> to vector<32x128xbf16>
      %c0_25 = arith.constant 0 : index
      %c0_26 = arith.constant 0 : index
      %43 = vector.load %arg6[%c0_25, %c0_26] : memref<32x32xbf16, #tpu.memory_space<vmem>>, vector<32x32xbf16>
      %cst_27 = arith.constant dense<0.000000e+00> : vector<32x128xf32>
      %44 = tpu.matmul %43, %42, %cst_27 {dimension_numbers = #tpu.dot_dimension_numbers<[1], [0], [0], [1], [0, 0, 1, 1], [], []>} : vector<32x32xbf16>, vector<32x128xbf16>, vector<32x128xf32> -> vector<32x128xf32>
      %c0_28 = arith.constant 0 : index
      %c0_29 = arith.constant 0 : index
      %45 = vector.load %arg10[%c0_28, %c0_29] : memref<32x1xf32, #tpu.memory_space<vmem>>, vector<32x1xf32>
      %46 = vector.broadcast %45 : vector<32x1xf32> to vector<32x128xf32>
      %47 = arith.addf %44, %46 : vector<32x128xf32>
      %48 = arith.truncf %47 : vector<32x128xf32> to vector<32x128xbf16>
      %c0_30 = arith.constant 0 : index
      %c0_31 = arith.constant 0 : index
      %49 = vector.load %arg7[%c0_30, %c0_31] : memref<32x32xbf16, #tpu.memory_space<vmem>>, vector<32x32xbf16>
      %cst_32 = arith.constant dense<0.000000e+00> : vector<32x128xf32>
      %50 = tpu.matmul %49, %42, %cst_32 {dimension_numbers = #tpu.dot_dimension_numbers<[1], [0], [0], [1], [0, 0, 1, 1], [], []>} : vector<32x32xbf16>, vector<32x128xbf16>, vector<32x128xf32> -> vector<32x128xf32>
      %c0_33 = arith.constant 0 : index
      %c0_34 = arith.constant 0 : index
      %51 = vector.load %arg11[%c0_33, %c0_34] : memref<32x1xf32, #tpu.memory_space<vmem>>, vector<32x1xf32>
      %52 = vector.broadcast %51 : vector<32x1xf32> to vector<32x128xf32>
      %53 = arith.addf %50, %52 : vector<32x128xf32>
      %54 = arith.truncf %53 : vector<32x128xf32> to vector<32x128xbf16>
      %c0_35 = arith.constant 0 : index
      %55 = arith.index_cast %1 : i32 to index
      %56 = vector.load %arg15[%c0_35, %55] : memref<32x256xbf16, #tpu.memory_space<vmem>>, vector<32x128xbf16>
      tpu.vector_store %arg15[%c0_35, %55], %48 {strides = array<i32>} : memref<32x256xbf16, #tpu.memory_space<vmem>>, vector<32x128xbf16>,
      %c0_36 = arith.constant 0 : index
      %57 = arith.index_cast %1 : i32 to index
      %58 = vector.load %arg16[%c0_36, %57] : memref<32x256xbf16, #tpu.memory_space<vmem>>, vector<32x128xbf16>
      tpu.vector_store %arg16[%c0_36, %57], %54 {strides = array<i32>} : memref<32x256xbf16, #tpu.memory_space<vmem>>, vector<32x128xbf16>,
    } else {
    }
    %c0 = arith.constant 0 : index
    %8 = arith.index_cast %1 : i32 to index
    %9 = vector.load %arg15[%c0, %8] : memref<32x256xbf16, #tpu.memory_space<vmem>>, vector<32x128xbf16>
    %c0_3 = arith.constant 0 : index
    %10 = arith.index_cast %1 : i32 to index
    %11 = vector.load %arg16[%c0_3, %10] : memref<32x256xbf16, #tpu.memory_space<vmem>>, vector<32x128xbf16>
    %c0_4 = arith.constant 0 : index
    %c0_5 = arith.constant 0 : index
    %12 = vector.load %arg14[%c0_4, %c0_5] : memref<128x32xbf16, #tpu.memory_space<vmem>>, vector<128x32xbf16>
    %cst = arith.constant dense<0.000000e+00> : vector<128x128xf32>
    %13 = tpu.matmul %12, %9, %cst {dimension_numbers = #tpu.dot_dimension_numbers<[1], [0], [0], [1], [0, 0, 1, 1], [], []>} : vector<128x32xbf16>, vector<32x128xbf16>, vector<128x128xf32> -> vector<128x128xf32>
    %c0_6 = arith.constant 0 : index
    %c0_7 = arith.constant 0 : index
    %14 = vector.load %arg17[%c0_6, %c0_7] : memref<128x1xf32, #tpu.memory_space<vmem>>, vector<128x1xf32>
    %cst_8 = arith.constant dense<0xFF800000> : vector<128xf32>
    %15 = vector.multi_reduction <maximumf>, %13, %cst_8 [1] : vector<128x128xf32> to vector<128xf32>
    %16 = vector.shape_cast %15 : vector<128xf32> to vector<128x1xf32>
    %17 = arith.maximumf %14, %16 : vector<128x1xf32>
    %18 = arith.subf %14, %17 : vector<128x1xf32>
    %19 = math.exp %18 : vector<128x1xf32>
    %20 = vector.broadcast %17 : vector<128x1xf32> to vector<128x128xf32>
    %21 = arith.subf %13, %20 : vector<128x128xf32>
    %22 = math.exp %21 : vector<128x128xf32>
    %c0_9 = arith.constant 0 : index
    %c0_10 = arith.constant 0 : index
    %23 = vector.load %arg18[%c0_9, %c0_10] : memref<128x1xf32, #tpu.memory_space<vmem>>, vector<128x1xf32>
    %24 = arith.mulf %19, %23 : vector<128x1xf32>
    %cst_11 = arith.constant dense<0.000000e+00> : vector<128xf32>
    %25 = vector.multi_reduction <add>, %22, %cst_11 [1] : vector<128x128xf32> to vector<128xf32>
    %26 = vector.shape_cast %25 : vector<128xf32> to vector<128x1xf32>
    %27 = arith.addf %24, %26 : vector<128x1xf32>
    %c0_12 = arith.constant 0 : index
    %c0_13 = arith.constant 0 : index
    %28 = vector.load %arg18[%c0_12, %c0_13] : memref<128x1xf32, #tpu.memory_space<vmem>>, vector<128x1xf32>
    tpu.vector_store %arg18[%c0_12, %c0_13], %27 {strides = array<i32>} : memref<128x1xf32, #tpu.memory_space<vmem>>, vector<128x1xf32>,
    %29 = arith.truncf %22 : vector<128x128xf32> to vector<128x128xbf16>
    %cst_14 = arith.constant dense<0.000000e+00> : vector<128x32xf32>
    %30 = tpu.matmul %29, %11, %cst_14 {dimension_numbers = #tpu.dot_dimension_numbers<[1], [1], [0], [0], [0, 0, 1, 0], [], []>} : vector<128x128xbf16>, vector<32x128xbf16>, vector<128x32xf32> -> vector<128x32xf32>
    %c0_15 = arith.constant 0 : index
    %c0_16 = arith.constant 0 : index
    %31 = vector.load %arg19[%c0_15, %c0_16] : memref<128x32xf32, #tpu.memory_space<vmem>>, vector<128x32xf32>
    %32 = vector.broadcast %19 : vector<128x1xf32> to vector<128x32xf32>
    %33 = arith.mulf %32, %31 : vector<128x32xf32>
    %34 = arith.addf %33, %30 : vector<128x32xf32>
    %c0_17 = arith.constant 0 : index
    %c0_18 = arith.constant 0 : index
    %35 = vector.load %arg19[%c0_17, %c0_18] : memref<128x32xf32, #tpu.memory_space<vmem>>, vector<128x32xf32>
    tpu.vector_store %arg19[%c0_17, %c0_18], %34 {strides = array<i32>} : memref<128x32xf32, #tpu.memory_space<vmem>>, vector<128x32xf32>,
    %c0_19 = arith.constant 0 : index
    %c0_20 = arith.constant 0 : index
    %36 = vector.load %arg17[%c0_19, %c0_20] : memref<128x1xf32, #tpu.memory_space<vmem>>, vector<128x1xf32>
    tpu.vector_store %arg17[%c0_19, %c0_20], %17 {strides = array<i32>} : memref<128x1xf32, #tpu.memory_space<vmem>>, vector<128x1xf32>,
    %c1_i32 = arith.constant 1 : i32
    %37 = arith.cmpi eq, %arg2, %c1_i32 : i32
    %38 = arith.extui %37 : i1 to i32
    %c0_i32_21 = arith.constant 0 : i32
    %39 = arith.cmpi ne, %38, %c0_i32_21 : i32
    scf.if %39 {
      %c0_22 = arith.constant 0 : index
      %c0_23 = arith.constant 0 : index
      %40 = vector.load %arg18[%c0_22, %c0_23] : memref<128x1xf32, #tpu.memory_space<vmem>>, vector<128x1xf32>
      %41 = tpu.reciprocal %40 {approx = true} : vector<128x1xf32> -> vector<128x1xf32>
      %c0_24 = arith.constant 0 : index
      %c0_25 = arith.constant 0 : index
      %42 = vector.load %arg19[%c0_24, %c0_25] : memref<128x32xf32, #tpu.memory_space<vmem>>, vector<128x32xf32>
      %43 = vector.broadcast %41 : vector<128x1xf32> to vector<128x32xf32>
      %44 = arith.mulf %42, %43 : vector<128x32xf32>
      %45 = arith.truncf %44 : vector<128x32xf32> to vector<128x32xbf16>
      %c0_26 = arith.constant 0 : index
      %c0_27 = arith.constant 0 : index
      %46 = vector.load %arg8[%c0_26, %c0_27] : memref<32x32xbf16, #tpu.memory_space<vmem>>, vector<32x32xbf16>
      %cst_28 = arith.constant dense<0.000000e+00> : vector<32x128xf32>
      %47 = tpu.matmul %46, %45, %cst_28 {dimension_numbers = #tpu.dot_dimension_numbers<[1], [1], [0], [0], [0, 0, 1, 0], [], []>} : vector<32x32xbf16>, vector<128x32xbf16>, vector<32x128xf32> -> vector<32x128xf32>
      %c0_29 = arith.constant 0 : index
      %c0_30 = arith.constant 0 : index
      %48 = vector.load %arg12[%c0_29, %c0_30] : memref<32x1xf32, #tpu.memory_space<vmem>>, vector<32x1xf32>
      %49 = vector.broadcast %48 : vector<32x1xf32> to vector<32x128xf32>
      %50 = arith.addf %47, %49 : vector<32x128xf32>
      %c0_31 = arith.constant 0 : index
      %c0_32 = arith.constant 0 : index
      %c0_33 = arith.constant 0 : index
      %51 = vector.load %arg3[%c0_31, %c0_32, %c0_33] : memref<1x32x128xf32, #tpu.memory_space<vmem>>, vector<1x32x128xf32>
      %52 = vector.shape_cast %51 : vector<1x32x128xf32> to vector<32x128xf32>
      %53 = arith.addf %50, %52 : vector<32x128xf32>
      %c0_34 = arith.constant 0 : index
      %c0_35 = arith.constant 0 : index
      %c0_36 = arith.constant 0 : index
      %54 = vector.load %arg13[%c0_34, %c0_35, %c0_36] : memref<1x32x128xf32, #tpu.memory_space<vmem>>, vector<1x32x128xf32>
      %55 = vector.shape_cast %54 : vector<1x32x128xf32> to vector<32x128xf32>
      %56 = vector.shape_cast %53 : vector<32x128xf32> to vector<1x32x128xf32>
      tpu.vector_store %arg13[%c0_34, %c0_35, %c0_36], %56 {strides = array<i32>} : memref<1x32x128xf32, #tpu.memory_space<vmem>>, vector<1x32x128xf32>,
    } else {
    }
    return
  }
  func.func @transform_0(%arg0: i32, %arg1: i32, %arg2: i32) -> (i32, i32, i32) {
    %c0_i32 = arith.constant 0 : i32
    %c0_i32_0 = arith.constant 0 : i32
    return %arg0, %c0_i32, %arg1 : i32, i32, i32
  }
  func.func @transform_1(%arg0: i32, %arg1: i32, %arg2: i32) -> (i32, i32, i32) {
    %c0_i32 = arith.constant 0 : i32
    %0 = arith.cmpi eq, %arg1, %c0_i32 : i32
    %c0_i32_0 = arith.constant 0 : i32
    %1 = arith.select %0, %arg2, %c0_i32_0 : i32
    %c0_i32_1 = arith.constant 0 : i32
    %c0_i32_2 = arith.constant 0 : i32
    return %arg0, %c0_i32_1, %1 : i32, i32, i32
  }
  func.func @transform_2(%arg0: i32, %arg1: i32, %arg2: i32) -> (i32, i32) {
    %c0_i32 = arith.constant 0 : i32
    %c0_i32_0 = arith.constant 0 : i32
    %c0_i32_1 = arith.constant 0 : i32
    return %c0_i32, %c0_i32_0 : i32, i32
  }
  func.func @transform_3(%arg0: i32, %arg1: i32, %arg2: i32) -> (i32, i32) {
    %c0_i32 = arith.constant 0 : i32
    %c0_i32_0 = arith.constant 0 : i32
    %c0_i32_1 = arith.constant 0 : i32
    return %c0_i32, %c0_i32_0 : i32, i32
  }
  func.func @transform_4(%arg0: i32, %arg1: i32, %arg2: i32) -> (i32, i32) {
    %c0_i32 = arith.constant 0 : i32
    %c0_i32_0 = arith.constant 0 : i32
    %c0_i32_1 = arith.constant 0 : i32
    return %c0_i32, %c0_i32_0 : i32, i32
  }
  func.func @transform_5(%arg0: i32, %arg1: i32, %arg2: i32) -> (i32, i32) {
    %c0_i32 = arith.constant 0 : i32
    %c0_i32_0 = arith.constant 0 : i32
    %c0_i32_1 = arith.constant 0 : i32
    return %c0_i32, %c0_i32_0 : i32, i32
  }
  func.func @transform_6(%arg0: i32, %arg1: i32, %arg2: i32) -> (i32, i32) {
    %c0_i32 = arith.constant 0 : i32
    %c0_i32_0 = arith.constant 0 : i32
    %c0_i32_1 = arith.constant 0 : i32
    return %c0_i32, %c0_i32_0 : i32, i32
  }
  func.func @transform_7(%arg0: i32, %arg1: i32, %arg2: i32) -> (i32, i32) {
    %c0_i32 = arith.constant 0 : i32
    %c0_i32_0 = arith.constant 0 : i32
    %c0_i32_1 = arith.constant 0 : i32
    return %c0_i32, %c0_i32_0 : i32, i32
  }
  func.func @transform_8(%arg0: i32, %arg1: i32, %arg2: i32) -> (i32, i32) {
    %c0_i32 = arith.constant 0 : i32
    %c0_i32_0 = arith.constant 0 : i32
    %c0_i32_1 = arith.constant 0 : i32
    return %c0_i32, %c0_i32_0 : i32, i32
  }
  func.func @transform_9(%arg0: i32, %arg1: i32, %arg2: i32) -> (i32, i32) {
    %c0_i32 = arith.constant 0 : i32
    %c0_i32_0 = arith.constant 0 : i32
    %c0_i32_1 = arith.constant 0 : i32
    return %c0_i32, %c0_i32_0 : i32, i32
  }
  func.func @transform_10(%arg0: i32, %arg1: i32, %arg2: i32) -> (i32, i32, i32) {
    %c0_i32 = arith.constant 0 : i32
    %c0_i32_0 = arith.constant 0 : i32
    return %arg0, %c0_i32, %arg1 : i32, i32, i32
  }
}

</mosaic_0001>

<bundles_post_ra>
// kernel: tpu_custom_call.1
= control target key start
LH: loop header
LB: loop body
LE: loop exit
PB: predicated region body
PF: predicated region fallthrough
CT: control target
= control target key end

     0   :  { %s3713_s0 = inlined_call_operand.hbm [shape: f32[2,32,256], index: 0, kind: input, shape index: {}]   ;;  %s3714_s1 = inlined_call_operand.hbm [shape: f32[2,32,256], index: 1, kind: input, shape index: {}]   ;;  %s3715_s2 = inlined_call_operand.vmem [shape: bf16[32,32], index: 2, kind: input, shape index: {}]   ;;  %s3716_s3 = inlined_call_operand.vmem [shape: bf16[32,32], index: 3, kind: input, shape index: {}]   ;;  %s3717_s4 = inlined_call_operand.vmem [shape: bf16[32,32], index: 4, kind: input, shape index: {}]   ;;  %s3718_s5 = inlined_call_operand.vmem [shape: bf16[32,32], index: 5, kind: input, shape index: {}]   ;;  %s3719_s6 = inlined_call_operand.vmem [shape: f32[1,32], index: 6, kind: input, shape index: {}]   ;;  %s3720_s7 = inlined_call_operand.vmem [shape: f32[32,1], index: 7, kind: input, shape index: {}]   ;;  %s3721_s8 = inlined_call_operand.vmem [shape: f32[32,1], index: 8, kind: input, shape index: {}]   ;;  %s3722_s9 = inlined_call_operand.vmem [shape: f32[32,1], index: 9, kind: input, shape index: {}]   ;;  %s3723_s10 = inlined_call_operand.hbm [shape: f32[2,32,256], index: 10, kind: output, shape index: {}]  }
   0x1   :  { %3754 = sst [smem:[#allocation28_spill]] %s3713_s0 }
   0x2   :  { %3755 = sst [smem:[#allocation29_spill]] %s3714_s1 }
   0x3   :  { %3756 = sst [smem:[#allocation30_spill]] %s3715_s2 }
   0x4   :  { %3757 = sst [smem:[#allocation31_spill]] %s3716_s3 }
   0x5   :  { %3758 = sst [smem:[#allocation32_spill]] %s3717_s4 }
   0x6   :  { %3759 = sst [smem:[#allocation33_spill]] %s3718_s5 }
   0x7   :  { %3760 = sst [smem:[#allocation34_spill]] %s3719_s6 }
   0x8   :  { %3761 = sst [smem:[#allocation35_spill]] %s3720_s7 }
   0x9   :  { %3762 = sst [smem:[#allocation36_spill]] %s3721_s8 }
   0xa   :  { %3763 = sst [smem:[#allocation37_spill]] %s3722_s9 }
   0xb   :  { %3764 = sst [smem:[#allocation38_spill]] %s3723_s10 }
   0xc   :  { %15 = vsyncpa [#allocation9], 0 }
   0xd   :  { %17 = vsyncpa [#allocation9 + $0x1], 0 }
   0xe   :  { %18 = vsyncpa [#allocation12], 0 }
   0xf   :  { %20 = vsyncpa [#allocation12 + $0x1], 0 }
  0x10   :  { %21 = vsyncpa [#allocation10], 0 }
  0x11   :  { %23 = vsyncpa [#allocation10 + $0x1], 0  ;;  %s2824_s13 = smov 0   ;;  %s2826_s14 = smov 0  }
  0x12   :  { %s2828_s15 = smov 0   ;;  %s2830_s16 = smov 0  }
  0x13   :  { %s2832_s17 = smov 0   ;;  %s2834_s18 = smov 0  }
  0x14   :  { %s2836_s19 = smov 0   ;;  %s2838_s20 = smov 0  }
  0x15   :  { %s2840_s21 = smov 0   ;;  %s2842_s22 = smov 0  }
  0x16   :  { %s2844_s23 = smov 0   ;;  %s2846_s24 = smov 0  }
  0x17   :  { %s2848_s25 = smov 0  }
  0x18 LB: > { %3765 = sst [smem:[#allocation17_spill]] %s2717_s16  ;;  %s2093_s26 = sadd.s32 4294967295, %s2753_s25   ;;  %s2753_s25 = sphi %s2848_s25, %s29_s25   ;;  %s2749_s24 = sphi %s2846_s24, %s3833_s24   ;;  %s2745_s23 = sphi %s2844_s23, %s3825_s23   ;;  %s2741_s22 = sphi %s2842_s22, %s3824_s22   ;;  %s2737_s21 = sphi %s2840_s21, %s3832_s21   ;;  %s2733_s20 = sphi %s2838_s20, %s3823_s20   ;;  %s2729_s19 = sphi %s2836_s19, %s3822_s19   ;;  %s2725_s18 = sphi %s2834_s18, %s3831_s18   ;;  %s2721_s17 = sphi %s2832_s17, %s3830_s17   ;;  %s2717_s16 = sphi %s2830_s16, %s3829_s16   ;;  %s2713_s15 = sphi %s2828_s15, %s3828_s15   ;;  %s2709_s14 = sphi %s2826_s14, %s3827_s14   ;;  %s2705_s13 = sphi %s2824_s13, %s3826_s13  }
  0x19   : > { %3766 = sst [smem:[#allocation18_spill]] %s2729_s19  ;;  %s2094_s27 = sadd.s32 4294967294, %s2753_s25  }
  0x1a   : > { %3767 = sst [smem:[#allocation19_spill]] %s2733_s20  ;;  %p64_p0 = scmp.ne.s32.totalorder %s2725_s18, %s2721_s17 }
  0x1b   : > { %3768 = sst [smem:[#allocation20_spill]] %s2737_s21  ;;  %p3733_p1 = scmp.eq.s32.totalorder %s2753_s25, 0 }
  0x1c   : > { %3769 = sst [smem:[#allocation21_spill]] %s2741_s22  ;;  %p70_p2 = scmp.ne.s32.totalorder %s2721_s17, %s2717_s16 }
  0x1d   : > { %3770 = sst [smem:[#allocation22_spill]] %s2745_s23  ;;  %p2897_p3 = scmp.eq.s32.totalorder %s2093_s26, 0 }
  0x1e   : > { %p2903_p4 = por %p3733_p1, %p64_p0  ;;  %p296_p5 = scmp.eq.s32.totalorder %s2093_s26, 7 }
  0x1f   : > { %p2909_p6 = por %p2897_p3, %p70_p2  ;;  %p302_p7 = scmp.eq.s32.totalorder %s2094_s27, 7 }
  0x20   : > { %p2913_p8 = por %p296_p5, %p64_p0  ;;  %p3732_p10 = scmp.lt.s32.totalorder %s2753_s25, 8 }
  0x21   : > { %s3773_s11 = scalar_select %p2909_p6, 1, 0 }
  0x22   : > { %s3774_s12 = scalar_select %p2913_p8, 1, 0 }
  0x23   : > { %p2917_p9 = por %p302_p7, %p70_p2  ;;  %s346_s16 = sand.u32 1, %s2725_s18  }
  0x24   : > { %3775 = sst [smem:[#allocation23_spill]] %s3774_s12  ;;  %s3739_s10 = sshll.u32 %s2749_s24, 3 }
  0x25   : > { %s3776_s28 = scalar_select %p2917_p9, 1, 0 }
  0x26   : > { %s2097_s21 = sshll.u32 %s346_s16, 5  ;;  %s355_s26 = sadd.s32 %s2745_s23, %s3739_s10 }
  0x27   : > { %3777 = sst [smem:[#allocation24_spill]] %s3776_s28  ;;  %s2099_s5 = sshll.u32 %s355_s26, 7 }
  0x28   : > { %s350_s9 = scalar_lea.vmem [#allocation8], %s2097_s21  ;;  %s3778_s0 = sld [smem:[#allocation28_spill]] }
  0x29   : > { %s358_s8 = sshll.u32 %s350_s9, 4  ;;  %p2938_p11 = pnand %p3732_p10, %p2903_p4  ;;  %s2932_s8 = int_to_ptr.vmem [resolvable:$true] %s358_s8 }
  0x2a   : > { %s2943_s9 = scalar_lea.sflag [#allocation9], %s346_s16 }
  0x2b   : > { %p2553_p0 = pneg %p2938_p11 }
  0x2e   : > { %s2930_s27 = scalar_lea.hbm %s3778_s0, %s2099_s5  ;;  %s2556_s21 = scalar_lea.hbm %s3778_s0, 2048 }
  0x2f   : > { %s2551_s4 = scalar_lea.hbm %s2930_s27, 512  ;;  %p2557_p4 = scmp.lt.u32.totalorder %s2930_s27, %s3778_s0 }
  0x30   : > { %p2552_p13 = scmp.ne.s32.totalorder %s2930_s27, %s2551_s4  ;;  %p2558_p7 = scmp.lt.u32.totalorder %s2556_s21, %s2551_s4 }
  0x31   : > { %p2560_p1 = scmp.lt.u32.totalorder %s2551_s4, %s2930_s27 }
  0x32   : > { %p2554_p2 = pnand %p2553_p0, %p2552_p13  ;;  %p2559_p10 = por %p2558_p7, %p2557_p4 }
  0x34   : > { %p2555_p5 = pneg %p2554_p2  ;;  %p2561_p12 = por %p2560_p1, %p2559_p10 }
  0x36   : > { %p2562_p9 = pnand %p2561_p12, %p2555_p5 }
  0x38   : > { %2565 = shalt.err (!%p2562_p9)
}
  0x39   : > { %s2566_s16 = scalar_lea.vmem %s2932_s8, 512  ;;  %s2755_s5 = smov [#allocation8]  }
  0x3a   : > { %p2567_p13 = scmp.ne.s32.totalorder %s2932_s8, %s2566_s16  ;;  %s2571_s7 = sshll.u32 %s2755_s5, 4  ;;  %s2572_s7 = int_to_ptr.vmem [resolvable:$false] %s2571_s7 }
  0x3b   : > { %s2573_s30 = scalar_lea.vmem %s2572_s7, 1024  ;;  %p2574_p6 = scmp.lt.s32.totalorder %s2932_s8, %s2572_s7 }
  0x3c   : > { %p2569_p2 = pnand %p2567_p13, %p2553_p0  ;;  %p2575_p4 = scmp.lt.s32.totalorder %s2573_s30, %s2566_s16 }
  0x3e   : > { %p2570_p8 = pneg %p2569_p2  ;;  %p2576_p7 = por %p2575_p4, %p2574_p6 }
  0x40   : > { %p2577_p1 = pnand %p2576_p7, %p2570_p8 }
  0x42   : > { %2580 = shalt.err (!%p2577_p1)
}
  0x43   : > { %s3736_s4 = smov 256   ;;  %s3737_s21 = smov 128  }
  0x44   : > { %s3738_s26 = smov 8   ;;  %p390_p6 = scmp.lt.s32.totalorder %s2753_s25, 9 }
  0x45   : > { %2316 = dma.hbm_to_vmem [thread:$0]  (!%p2938_p11), %s2930_s27, 512, %s2932_s8, %s2943_s9, %s3736_s4, %s3737_s21, %s3738_s26  }
  0x46   : > { %p3780_p8 = scmp.ge.s32.totalorder %s2753_s25, 1  ;;  %s41_s7 = sadd.s32 1, %s2741_s22 }
  0x47   : > { %s44_s30 = sadd.s32 1, %s2745_s23  ;;  %p42_p10 = scmp.ge.s32.totalorder %s41_s7, 2 }
  0x48   : > { %p2978_p9 = pnand %p3780_p8, %p390_p6  ;;  %p80_p12 = scmp.eq.s32.totalorder %s2745_s23, 0 }
  0x49   : > { %s89_s28 = sadd.s32 1, %s2713_s15  ;;  %s3835_s7 = smov (%p42_p10, %s41_s7), 0 }
  0x4a   : > { %3782 = sst [smem:[#allocation25_spill]] %s3835_s7  ;;  %s3837_s30 = smov (!%p42_p10, %s44_s30), %s2745_s23 }
  0x4b   : > { %s81_s8 = scalar_select %p80_p12, %s2741_s22, 0 }
  0x4c   : > { %p46_p11 = scmp.ge.s32.totalorder %s3837_s30, 2  ;;  %p96_p0 = scmp.ne.s32.totalorder %s2713_s15, %s2709_s14 }
  0x4d   : > { %p102_p5 = scmp.ne.s32.totalorder %s2709_s14, %s2705_s13  ;;  %s368_s27 = sand.u32 1, %s2713_s15  }
  0x4e   : > { %s3839_s30 = smov (%p46_p11, %s3837_s30), 0  ;;  %s3784_s9 = sadd.s32 1, %s2749_s24 }
  0x4f   : > { %3783 = sst [smem:[#allocation26_spill]] %s3839_s30  ;;  %s3841_s9 = smov (!%p46_p11, %s3784_s9), %s2749_s24 }
  0x50   : > { %s53_s4 = ssub.s32 %s2745_s23, %s3839_s30  ;;  %p82_p13 = scmp.eq.s32.totalorder %s3839_s30, 0 }
  0x51   : > { %p50_p2 = scmp.ge.s32.totalorder %s3841_s9, 2  ;;  %p3005_p4 = por %p102_p5, %p2897_p3 }
  0x52   : > { %s83_s13 = scalar_select %p82_p13, %s3835_s7, 0 }
  0x53   : > { %s3785_s21 = scalar_select %p3005_p4, 1, 0 }
  0x54   : > { %s3843_s9 = smov (%p50_p2, %s3841_s9), 0  ;;  %s85_s26 = ssub.s32 %s81_s8, %s83_s13 }
  0x55   : > { %3786 = sst [smem:[#allocation27_spill]] %s3785_s21  ;;  %p3787_p7 = scmp.eq.s32.totalorder %s2753_s25, 0 }
  0x56   : > { %s52_s10 = ssub.s32 %s2749_s24, %s3843_s9  ;;  %s2100_s0 = sshll.u32 %s368_s27, 5 }
  0x57   : > { %p3014_p1 = por %p96_p0, %p3787_p7  ;;  %s54_s30 = sor.u32 %s53_s4, %s52_s10 }
  0x58   : > { %s86_s29 = sor.u32 %s85_s26, %s52_s10  ;;  %p55_p3 = scmp.eq.s32.totalorder %s54_s30, 0 }
  0x59   : > { %p87_p6 = scmp.eq.s32.totalorder %s86_s29, 0  ;;  %s3789_s23 = sshll.u32 %s2749_s24, 3 }
  0x5a   : > { %s379_s22 = sadd.s32 %s3789_s23, %s81_s8  ;;  %s3790_s7 = sadd.s32 1, %s2725_s18 }
  0x5b   : > { %s3025_s12 = scalar_select %p55_p3, %s2725_s18, %s3790_s7  }
  0x5c   : > { %s3028_s3 = scalar_select %p87_p6, %s2713_s15, %s89_s28  }
  0x5d   : > { %s2102_s13 = sshll.u32 %s379_s22, 7  ;;  %s372_s20 = scalar_lea.vmem [#allocation11], %s2100_s0 }
  0x5e   : > { %s382_s6 = sshll.u32 %s372_s20, 4  ;;  %s3791_s1 = sld [smem:[#allocation29_spill]]  ;;  %s3035_s6 = int_to_ptr.vmem [resolvable:$true] %s382_s6 }
  0x5f   : > { %p3792_p8 = scmp.lt.s32.totalorder %s2753_s25, 8  ;;  %s3045_s0 = scalar_lea.sflag [#allocation12], %s368_s27 }
  0x61   : > { %p3041_p10 = pnand %p3792_p8, %p3014_p1 }
  0x63   : > { %p2583_p11 = pneg %p3041_p10 }
  0x64   : > { %s3033_s21 = scalar_lea.hbm %s3791_s1, %s2102_s13  ;;  %s2586_s22 = scalar_lea.hbm %s3791_s1, 2048 }
  0x65   : > { %s2581_s20 = scalar_lea.hbm %s3033_s21, 512  ;;  %p2587_p13 = scmp.lt.u32.totalorder %s3033_s21, %s3791_s1 }
  0x66   : > { %p2582_p12 = scmp.ne.s32.totalorder %s3033_s21, %s2581_s20  ;;  %p2588_p2 = scmp.lt.u32.totalorder %s2586_s22, %s2581_s20 }
  0x67   : > { %p2590_p1 = scmp.lt.u32.totalorder %s2581_s20, %s3033_s21 }
  0x68   : > { %p2584_p0 = pnand %p2583_p11, %p2582_p12  ;;  %p2589_p7 = por %p2588_p2, %p2587_p13 }
  0x6a   : > { %p2585_p5 = pneg %p2584_p0  ;;  %p2591_p3 = por %p2590_p1, %p2589_p7 }
  0x6c   : > { %p2592_p6 = pnand %p2591_p3, %p2585_p5 }
  0x6e   : > { %2595 = shalt.err (!%p2592_p6)
}
  0x6f   : > { %s2596_s26 = scalar_lea.vmem %s3035_s6, 512  ;;  %s2759_s16 = smov [#allocation11]  }
  0x70   : > { %p2597_p8 = scmp.ne.s32.totalorder %s3035_s6, %s2596_s26  ;;  %s2601_s7 = sshll.u32 %s2759_s16, 4  ;;  %s2602_s7 = int_to_ptr.vmem [resolvable:$false] %s2601_s7 }
  0x71   : > { %s2603_s30 = scalar_lea.vmem %s2602_s7, 1024  ;;  %p2604_p4 = scmp.lt.s32.totalorder %s3035_s6, %s2602_s7 }
  0x72   : > { %p2599_p12 = pnand %p2597_p8, %p2583_p11  ;;  %p2605_p13 = scmp.lt.s32.totalorder %s2603_s30, %s2596_s26 }
  0x74   : > { %p2600_p0 = pneg %p2599_p12  ;;  %p2606_p2 = por %p2605_p13, %p2604_p4 }
  0x76   : > { %p2607_p7 = pnand %p2606_p2, %p2600_p0 }
  0x78   : > { %2610 = shalt.err (!%p2607_p7)
}
  0x79   : > { %s3794_s28 = smov 8   ;;  %s3795_s8 = smov 128  }
  0x7a   : > { %s3796_s27 = smov 256   ;;  %394 = sbr.rel (%p2978_p9) target bundleno = 1998 (0x7ce), region = 60 }
  0x7b   : > { %2319 = dma.hbm_to_vmem [thread:$0]  (!%p3041_p10), %s3033_s21, 512, %s3035_s6, %s3045_s0, %s3796_s27, %s3795_s8, %s3794_s28  }
  0x7c   : > { %s3079_s29 = sand.u32 (!%p2978_p9), 1, %s2721_s17   ;;  %p3797_p4 = scmp.ne.s32.totalorder (!%p2978_p9), %s3773_s11, 0 }
  0x7d   : > { %s2104_s13 = sshll.u32 (!%p2978_p9), %s3079_s29, 5  ;;  %s397_s20 = scalar_lea.sflag (!%p2978_p9), [#allocation9], %s3079_s29 }
  0x7e   : > { %s3083_s2 = scalar_lea.vmem (!%p2978_p9), [#allocation8], %s2104_s13 }
  0x81   : > { %2692 = dma.done.wait (%p3797_p4), %s397_s20, 512  }
  0x82   : > { %2694 = vsyncadd (%p3797_p4), %s397_s20, 4294966784  ;;  %s3798_s6 = sld [smem:[#allocation27_spill]]  ;;  %s405_s21 = sand.u32 1, %s2709_s14  }
  0x83   : > { %s2105_s5 = sshll.u32 %s405_s21, 5  ;;  %s406_s10 = scalar_lea.sflag [#allocation12], %s405_s21 }
  0x84   : > { %s3090_s0 = scalar_lea.vmem [#allocation11], %s2105_s5 }
  0x88   : > { %p3799_p9 = scmp.ne.s32.totalorder %s3798_s6, 0 }
  0x8a   : > { %2696 = dma.done.wait (%p3799_p9), %s406_s10, 512  }
  0x8b   : > { %2698 = vsyncadd (%p3799_p9), %s406_s10, 4294966784  ;;  %s3800_s19 = sld [smem:[#allocation18_spill]]  ;;  %s3097_s23 = scalar_lea.vmem [#allocation13], %s2104_s13 }
  0x91   : > { %s2107_s22 = sshll.u32 %s3800_s19, 7  ;;  %p2108_p10 = scmp.ne.s32.totalorder %s3800_s19, 0 }
  0x92   : > { %v509_v0 = vld [vmem:[%s3083_s2] sm:$0xff] (!%p2108_p10)  ;;  %v510_v1 = vld [vmem:[%s3083_s2 + $0x8] sm:$0xff] (!%p2108_p10)  ;;  %v511_v2 = vld [vmem:[%s3083_s2 + $0x10] sm:$0xff] (!%p2108_p10)  ;;  %s3801_s26 = sld [smem:[#allocation30_spill]] (!%p2108_p10)  ;;  %vm459_vm0 = vcmask (!%p2108_p10), 7168   ;;  %vm492_vm1 = vcmask (!%p2108_p10), 261120  }
  0x93   : > { %458 = sbr.rel (%p2108_p10) target bundleno = 558 (0x22e), region = 72  ;;  %513 = vxpose.xlu0.b32.start [1/4] (short) (!%p2108_p10), %v509_v0, 128  ;;  %v2760_v4 = vmov (!%p2108_p10), -inf   ;;  %v2761_v5 = vmov (!%p2108_p10), 0.0   ;;  %v512_v7 = vld [vmem:[%s3083_s2 + $0x18] sm:$0xff] (!%p2108_p10)  ;;  %s3802_s8 = sld [smem:[#allocation34_spill]] (!%p2108_p10) }
  0x94   : > { %460 = vst.msk [vmem:[#allocation5] sm:$0xff] (!%p2108_p10), %vm459_vm0, %v2760_v4  ;;  %461 = vst.msk [vmem:[#allocation5 + $0x8] sm:$0xff] (!%p2108_p10), %vm459_vm0, %v2760_v4 }
  0x95   : > { %462 = vst.msk [vmem:[#allocation5 + $0x10] sm:$0xff] (!%p2108_p10), %vm459_vm0, %v2760_v4  ;;  %463 = vst.msk [vmem:[#allocation5 + $0x18] sm:$0xff] (!%p2108_p10), %vm459_vm0, %v2760_v4 }
  0x96   : > { %464 = vst.msk [vmem:[#allocation5 + $0x20] sm:$0xff] (!%p2108_p10), %vm459_vm0, %v2760_v4  ;;  %465 = vst.msk [vmem:[#allocation5 + $0x28] sm:$0xff] (!%p2108_p10), %vm459_vm0, %v2760_v4 }
  0x97   : > { %514 = vxpose.xlu0.b32.cont [2/4] (short) (!%p2108_p10), %v510_v1, 128  ;;  %466 = vst.msk [vmem:[#allocation5 + $0x30] sm:$0xff] (!%p2108_p10), %vm459_vm0, %v2760_v4  ;;  %467 = vst.msk [vmem:[#allocation5 + $0x38] sm:$0xff] (!%p2108_p10), %vm459_vm0, %v2760_v4 }
  0x98   : > { %v2441_v3 = vld [vmem:[%s3801_s26] sm:$0xff] (!%p2108_p10)   ;;  %468 = vst.msk [vmem:[#allocation5 + $0x40] sm:$0xff] (!%p2108_p10), %vm459_vm0, %v2760_v4  ;;  %469 = vst.msk [vmem:[#allocation5 + $0x48] sm:$0xff] (!%p2108_p10), %vm459_vm0, %v2760_v4  ;;  %v2442_v6 = vld [vmem:[%s3801_s26 + $0x8] sm:$0xff] (!%p2108_p10)  }
  0x99   : > { %470 = vst.msk [vmem:[#allocation5 + $0x50] sm:$0xff] (!%p2108_p10), %vm459_vm0, %v2760_v4  ;;  %471 = vst.msk [vmem:[#allocation5 + $0x58] sm:$0xff] (!%p2108_p10), %vm459_vm0, %v2760_v4  ;;  %2199 = vmatprep.subr.bf16.mxu0 (!%p2108_p10), %v2441_v3  ;;  %2295 = vmatprep.subr.bf16.mxu1 (!%p2108_p10), %v2441_v3  ;;  %v2109_v33 = vld [vmem:[%s3802_s8] ss:$0 sm:$0xff] (!%p2108_p10) }
  0x9a   : > { %472 = vst.msk [vmem:[#allocation5 + $0x60] sm:$0xff] %vm459_vm0, %v2760_v4  ;;  %473 = vst.msk [vmem:[#allocation5 + $0x68] sm:$0xff] %vm459_vm0, %v2760_v4  ;;  %2200 = vmatpush3.bf16.msra.mxu0 %v2441_v3  ;;  %2297 = vmatpush3.bf16.msra.mxu1 %v2441_v3 }
  0x9b   : > { %474 = vst.msk [vmem:[#allocation5 + $0x70] sm:$0xff] %vm459_vm0, %v2760_v4  ;;  %475 = vst.msk [vmem:[#allocation5 + $0x78] sm:$0xff] %vm459_vm0, %v2760_v4  ;;  %515 = vxpose.xlu0.b32.cont [3/4] (short) %v511_v2, 128  ;;  %2201 = vmatprep.subr.bf16.mxu0 %v2442_v6 }
  0x9c   : > { %476 = vst.msk [vmem:[#allocation6] sm:$0xff] %vm459_vm0, %v2761_v5  ;;  %477 = vst.msk [vmem:[#allocation6 + $0x8] sm:$0xff] %vm459_vm0, %v2761_v5  ;;  %2296 = vmatprep.subr.bf16.mxu1 %v2442_v6 }
  0x9d   : > { %478 = vst.msk [vmem:[#allocation6 + $0x10] sm:$0xff] %vm459_vm0, %v2761_v5  ;;  %479 = vst.msk [vmem:[#allocation6 + $0x18] sm:$0xff] %vm459_vm0, %v2761_v5 }
  0x9e   : > { %480 = vst.msk [vmem:[#allocation6 + $0x20] sm:$0xff] %vm459_vm0, %v2761_v5  ;;  %481 = vst.msk [vmem:[#allocation6 + $0x28] sm:$0xff] %vm459_vm0, %v2761_v5  ;;  %2202 = vmatpush3.bf16.msra.mxu0 %v2442_v6  ;;  %2298 = vmatpush3.bf16.msra.mxu1 %v2442_v6 }
  0x9f   : > { %482 = vst.msk [vmem:[#allocation6 + $0x30] sm:$0xff] %vm459_vm0, %v2761_v5  ;;  %483 = vst.msk [vmem:[#allocation6 + $0x38] sm:$0xff] %vm459_vm0, %v2761_v5  ;;  %516 = vxpose.xlu0.b32.end [4/4] (short) %v512_v7, 128 }
  0xa0   : > { %484 = vst.msk [vmem:[#allocation6 + $0x40] sm:$0xff] %vm459_vm0, %v2761_v5  ;;  %485 = vst.msk [vmem:[#allocation6 + $0x48] sm:$0xff] %vm459_vm0, %v2761_v5 }
  0xa1   : > { %486 = vst.msk [vmem:[#allocation6 + $0x50] sm:$0xff] %vm459_vm0, %v2761_v5  ;;  %487 = vst.msk [vmem:[#allocation6 + $0x58] sm:$0xff] %vm459_vm0, %v2761_v5 }
  0xa2   : > { %488 = vst.msk [vmem:[#allocation6 + $0x60] sm:$0xff] %vm459_vm0, %v2761_v5  ;;  %489 = vst.msk [vmem:[#allocation6 + $0x68] sm:$0xff] %vm459_vm0, %v2761_v5 }
  0xa3   : > { %490 = vst.msk [vmem:[#allocation6 + $0x70] sm:$0xff] %vm459_vm0, %v2761_v5  ;;  %491 = vst.msk [vmem:[#allocation6 + $0x78] sm:$0xff] %vm459_vm0, %v2761_v5 }
  0xa4   : > { %493 = vst.msk [vmem:[#allocation7] sm:$0xff] %vm492_vm1, %v2761_v5  ;;  %494 = vst.msk [vmem:[#allocation7 + $0x8] sm:$0xff] %vm492_vm1, %v2761_v5 }
  0xa5   : > { %495 = vst.msk [vmem:[#allocation7 + $0x10] sm:$0xff] %vm492_vm1, %v2761_v5  ;;  %496 = vst.msk [vmem:[#allocation7 + $0x18] sm:$0xff] %vm492_vm1, %v2761_v5 }
  0xa6   : > { %497 = vst.msk [vmem:[#allocation7 + $0x20] sm:$0xff] %vm492_vm1, %v2761_v5  ;;  %498 = vst.msk [vmem:[#allocation7 + $0x28] sm:$0xff] %vm492_vm1, %v2761_v5 }
  0xa7   : > { %499 = vst.msk [vmem:[#allocation7 + $0x30] sm:$0xff] %vm492_vm1, %v2761_v5  ;;  %500 = vst.msk [vmem:[#allocation7 + $0x38] sm:$0xff] %vm492_vm1, %v2761_v5 }
  0xa8   : > { %501 = vst.msk [vmem:[#allocation7 + $0x40] sm:$0xff] %vm492_vm1, %v2761_v5  ;;  %502 = vst.msk [vmem:[#allocation7 + $0x48] sm:$0xff] %vm492_vm1, %v2761_v5 }
  0xa9   : > { %503 = vst.msk [vmem:[#allocation7 + $0x50] sm:$0xff] %vm492_vm1, %v2761_v5  ;;  %504 = vst.msk [vmem:[#allocation7 + $0x58] sm:$0xff] %vm492_vm1, %v2761_v5 }
  0xaa   : > { %505 = vst.msk [vmem:[#allocation7 + $0x60] sm:$0xff] %vm492_vm1, %v2761_v5  ;;  %506 = vst.msk [vmem:[#allocation7 + $0x68] sm:$0xff] %vm492_vm1, %v2761_v5 }
  0xab   : > { %507 = vst.msk [vmem:[#allocation7 + $0x70] sm:$0xff] %vm492_vm1, %v2761_v5  ;;  %508 = vst.msk [vmem:[#allocation7 + $0x78] sm:$0xff] %vm492_vm1, %v2761_v5 }
 0x113   : > { %v529_v8 = vpop.trf.xlu0 }
 0x117   : > { %v530_v9 = vpop.trf.xlu0 }
 0x118   : > { %v545_v10 = vpack.c.bf16 %v530_v9, %v529_v8 }
 0x11a   : > { %2203 = vmatprep.mubr.msk.bf16.mxu0 %vm492_vm1, %v545_v10 }
 0x11b   : > { %v531_v11 = vpop.trf.xlu0 }
 0x11f   : > { %v532_v12 = vpop.trf.xlu0 }
 0x120   : > { %v546_v13 = vpack.c.bf16 %v532_v12, %v531_v11 }
 0x122   : > { %2204 = vmatmul.mubr.msk.bf16.vlgmr.msra.gmra.mrb[0].mxu0 %vm492_vm1, %v546_v13 }
 0x123   : > { %v533_v14 = vpop.trf.xlu0 }
 0x127   : > { %v534_v15 = vpop.trf.xlu0 }
 0x128   : > { %v547_v16 = vpack.c.bf16 %v534_v15, %v533_v14 }
 0x12a   : > { %2207 = vmatprep.mubr.msk.bf16.mxu0 %vm492_vm1, %v547_v16 }
 0x12b   : > { %v535_v17 = vpop.trf.xlu0 }
 0x12f   : > { %v536_v18 = vpop.trf.xlu0 }
 0x130   : > { %v548_v19 = vpack.c.bf16 %v536_v18, %v535_v17 }
 0x132   : > { %2208 = vmatmul.mubr.msk.bf16.gmra.mrb[4].mxu0 %vm492_vm1, %v548_v19 }
 0x133   : > { %v537_v20 = vpop.trf.xlu0 }
 0x137   : > { %v538_v21 = vpop.trf.xlu0 }
 0x138   : > { %v549_v22 = vpack.c.bf16 %v538_v21, %v537_v20 }
 0x13a   : > { %2211 = vmatprep.mubr.msk.bf16.mxu1 %vm492_vm1, %v549_v22 }
 0x13b   : > { %v539_v23 = vpop.trf.xlu0 }
 0x13f   : > { %v540_v24 = vpop.trf.xlu0 }
 0x140   : > { %v550_v25 = vpack.c.bf16 %v540_v24, %v539_v23 }
 0x142   : > { %2212 = vmatmul.mubr.msk.bf16.vlgmr.msra.gmra.mrb[0].mxu1 %vm492_vm1, %v550_v25 }
 0x143   : > { %v541_v26 = vpop.trf.xlu0 }
 0x147   : > { %v542_v27 = vpop.trf.xlu0 }
 0x148   : > { %v551_v28 = vpack.c.bf16 %v542_v27, %v541_v26 }
 0x14a   : > { %2215 = vmatprep.mubr.msk.bf16.mxu1 %vm492_vm1, %v551_v28 }
 0x14b   : > { %v543_v29 = vpop.trf.xlu0 }
 0x14f   : > { %v544_v30 = vpop.trf.xlu0 }
 0x150   : > { %v552_v31 = vpack.c.bf16 %v544_v30, %v543_v29 }
 0x152   : > { %2216 = vmatmul.mubr.msk.bf16.gmra.mrb[4].mxu1 %vm492_vm1, %v552_v31 }
 0x1f5   : > { %v2205_v32 = vpop.f32.mrb[0].mxu0 }
 0x1f6   : > { %v634_v34 = vpop.f32.mrb[1].mxu0  ;;  %v643_v36 = vadd.f32 %v2205_v32, %v2109_v33 }
 0x1f7   : > { %v2206_v35 = vpop.f32.mrb[2].mxu0  ;;  %v635_v39 = vadd.f32 %v2109_v33, %v634_v34 }
 0x1f8   : > { %v646_v37 = vadd.f32 %v2206_v35, %v2109_v33  ;;  %v637_v38 = vpop.f32.mrb[3].mxu0 }
 0x1f9   : > { %v638_v40 = vadd.f32 %v2109_v33, %v637_v38 }
 0x1fa   : > { %v698_v41 = vpack.c.bf16 %v646_v37, %v643_v36 }
 0x1fb   : > { %v697_v42 = vpack.c.bf16 %v638_v40, %v635_v39 }
 0x1fc   : > { %706 = vst.msk [vmem:[#allocation2 + $0x8] sm:$0xff] %vm492_vm1, %v698_v41 }
 0x1fd   : > { %705 = vst.msk [vmem:[#allocation2] sm:$0xff] %vm492_vm1, %v697_v42 }
 0x205   : > { %v2209_v43 = vpop.f32.mrb[4].mxu0 }
 0x206   : > { %v650_v44 = vpop.f32.mrb[5].mxu0  ;;  %v659_v46 = vadd.f32 %v2209_v43, %v2109_v33 }
 0x207   : > { %v2210_v45 = vpop.f32.mrb[6].mxu0  ;;  %v651_v49 = vadd.f32 %v2109_v33, %v650_v44 }
 0x208   : > { %v662_v47 = vadd.f32 %v2210_v45, %v2109_v33  ;;  %v653_v48 = vpop.f32.mrb[7].mxu0 }
 0x209   : > { %v654_v50 = vadd.f32 %v2109_v33, %v653_v48 }
 0x20a   : > { %v700_v51 = vpack.c.bf16 %v662_v47, %v659_v46 }
 0x20b   : > { %v699_v52 = vpack.c.bf16 %v654_v50, %v651_v49 }
 0x20c   : > { %708 = vst.msk [vmem:[#allocation2 + $0x18] sm:$0xff] %vm492_vm1, %v700_v51 }
 0x20d   : > { %707 = vst.msk [vmem:[#allocation2 + $0x10] sm:$0xff] %vm492_vm1, %v699_v52 }
 0x215   : > { %v2213_v53 = vpop.f32.mrb[0].mxu1 }
 0x216   : > { %v666_v54 = vpop.f32.mrb[1].mxu1  ;;  %v675_v56 = vadd.f32 %v2213_v53, %v2109_v33 }
 0x217   : > { %v2214_v55 = vpop.f32.mrb[2].mxu1  ;;  %v667_v59 = vadd.f32 %v2109_v33, %v666_v54 }
 0x218   : > { %v678_v57 = vadd.f32 %v2214_v55, %v2109_v33  ;;  %v669_v58 = vpop.f32.mrb[3].mxu1 }
 0x219   : > { %v670_v60 = vadd.f32 %v2109_v33, %v669_v58 }
 0x21a   : > { %v702_v61 = vpack.c.bf16 %v678_v57, %v675_v56 }
 0x21b   : > { %v701_v62 = vpack.c.bf16 %v670_v60, %v667_v59 }
 0x21c   : > { %710 = vst.msk [vmem:[#allocation2 + $0x28] sm:$0xff] %vm492_vm1, %v702_v61 }
 0x21d   : > { %709 = vst.msk [vmem:[#allocation2 + $0x20] sm:$0xff] %vm492_vm1, %v701_v62 }
 0x225   : > { %v2217_v63 = vpop.f32.mrb[4].mxu1 }
 0x226   : > { %v682_v0 = vpop.f32.mrb[5].mxu1  ;;  %v691_v2 = vadd.f32 %v2217_v63, %v2109_v33 }
 0x227   : > { %v2218_v1 = vpop.f32.mrb[6].mxu1  ;;  %v683_v5 = vadd.f32 %v2109_v33, %v682_v0 }
 0x228   : > { %v694_v3 = vadd.f32 %v2218_v1, %v2109_v33  ;;  %v685_v4 = vpop.f32.mrb[7].mxu1 }
 0x229   : > { %v686_v6 = vadd.f32 %v2109_v33, %v685_v4 }
 0x22a   : > { %v704_v7 = vpack.c.bf16 %v694_v3, %v691_v2 }
 0x22b   : > { %v703_v8 = vpack.c.bf16 %v686_v6, %v683_v5 }
 0x22c   : > { %712 = vst.msk [vmem:[#allocation2 + $0x38] sm:$0xff] %vm492_vm1, %v704_v7 }
 0x22d   : > { %711 = vst.msk [vmem:[#allocation2 + $0x30] sm:$0xff] %vm492_vm1, %v703_v8 }
 0x22e PF: > { %s3803_s27 = sld [smem:[#allocation19_spill]] }
 0x234   : > { %p2120_p11 = scmp.ne.s32.totalorder %s3803_s27, 0 }
 0x235   : > { %v717_v9 = vld [vmem:[%s3090_s0] sm:$0xff] (!%p2120_p11)  ;;  %v718_v10 = vld [vmem:[%s3090_s0 + $0x8] sm:$0xff] (!%p2120_p11)  ;;  %v719_v11 = vld [vmem:[%s3090_s0 + $0x10] sm:$0xff] (!%p2120_p11)  ;;  %v2762_v14 = vmov (!%p2120_p11), 0   ;;  %s3804_s6 = sld [smem:[#allocation31_spill]] (!%p2120_p11)  ;;  %vm761_vm2 = vcmask (!%p2120_p11), 261120  }
 0x236   : > { %716 = sbr.rel (%p2120_p11) target bundleno = 798 (0x31e), region = 76  ;;  %v721_v12 = vpack.c.bf16 (!%p2120_p11), %v718_v10, %v717_v9  ;;  %v720_v13 = vld [vmem:[%s3090_s0 + $0x18] sm:$0xff] (!%p2120_p11)  ;;  %2444 = vset.pattern.permute.xlu1 (!%p2120_p11), %v2762_v14  ;;  %2443 = vset.pattern.permute.xlu0 (!%p2120_p11), %v2762_v14  ;;  %s3805_s10 = sld [smem:[#allocation32_spill]] (!%p2120_p11) }
 0x237   : > { %v722_v15 = vpack.c.bf16 (!%p2120_p11), %v720_v13, %v719_v11  ;;  %s3806_s11 = sld [smem:[#allocation35_spill]] (!%p2120_p11)  ;;  %s3808_s4 = sld [smem:[#allocation36_spill]] (!%p2120_p11) }
 0x238   : > { %2219 = vmatprep.subr.bf16.mxu0 (!%p2120_p11), %v721_v12  ;;  %2227 = vmatprep.subr.bf16.mxu1 (!%p2120_p11), %v721_v12  ;;  %s914_s13 = sshra.s32 (!%p2120_p11), %s2107_s22, 7 }
 0x239   : > { %2220 = vmatpush3.bf16.msra.mxu0 (!%p2120_p11), %v721_v12  ;;  %2228 = vmatpush3.bf16.msra.mxu1 (!%p2120_p11), %v721_v12  ;;  %s2129_s20 = sshll.u32 (!%p2120_p11), %s914_s13, 3 }
 0x23a   : > { %2221 = vmatprep.subr.bf16.mxu0 (!%p2120_p11), %v722_v15  ;;  %2229 = vmatprep.subr.bf16.mxu1 (!%p2120_p11), %v722_v15  ;;  %s917_s21 = scalar_lea.vmem (!%p2120_p11), [#allocation3], %s2129_s20  ;;  %s921_s5 = scalar_lea.vmem (!%p2120_p11), [#allocation4], %s2129_s20 }
 0x23b   : > { %v2445_v16 = vld [vmem:[%s3804_s6] sm:$0xff] (!%p2120_p11)   ;;  %v2447_v20 = vld [vmem:[%s3804_s6 + $0x8] sm:$0xff] (!%p2120_p11)  }
 0x23c   : > { %v2446_v17 = vld [vmem:[%s3805_s10] sm:$0xff] (!%p2120_p11)   ;;  %2223 = vmatprep.mubr.msk.bf16.mxu0 (!%p2120_p11), %vm761_vm2, %v2445_v16  ;;  %v2448_v21 = vld [vmem:[%s3805_s10 + $0x8] sm:$0xff] (!%p2120_p11)  }
 0x23d   : > { %v729_v18 = vld [vmem:[%s3806_s11 + $0x10] sm:$0xff]  ;;  %v727_v19 = vld [vmem:[%s3806_s11] sm:$0xff]  ;;  %2231 = vmatprep.mubr.msk.bf16.mxu1 %vm761_vm2, %v2446_v17  ;;  %2222 = vmatpush3.bf16.msra.mxu0 %v722_v15  ;;  %v730_v22 = vld [vmem:[%s3806_s11 + $0x18] sm:$0xff] }
 0x23e   : > { %743 = vperm.xlu1 %2444, %v729_v18   ;;  %733 = vperm.xlu0 %2443, %v727_v19   ;;  %v728_v23 = vld [vmem:[%s3806_s11 + $0x8] sm:$0xff]  ;;  %v823_v25 = vld [vmem:[%s3808_s4] sm:$0xff]  ;;  %v826_v26 = vld [vmem:[%s3808_s4 + $0x18] sm:$0xff] }
 0x23f   : > { %2230 = vmatpush3.bf16.msra.mxu1 %v722_v15  ;;  %v824_v24 = vld [vmem:[%s3808_s4 + $0x8] sm:$0xff]  ;;  %v825_v27 = vld [vmem:[%s3808_s4 + $0x10] sm:$0xff] }
 0x240   : > { %2224 = vmatmul.mubr.msk.bf16.vlgmr.msra.gmra.mrb[0].mxu0 %vm761_vm2, %v2447_v20 }
 0x242   : > { %2232 = vmatmul.mubr.msk.bf16.vlgmr.msra.gmra.mrb[0].mxu1 %vm761_vm2, %v2448_v21  ;;  %748 = vperm.xlu1 %2444, %v730_v22  }
 0x243   : > { %738 = vperm.xlu0 %2443, %v728_v23  }
 0x246   : > { %834 = vperm.xlu1 %2444, %v824_v24  }
 0x247   : > { %829 = vperm.xlu0 %2443, %v823_v25  }
 0x24a   : > { %844 = vperm.xlu1 %2444, %v826_v26  }
 0x24b   : > { %839 = vperm.xlu0 %2443, %v825_v27  }
 0x2bd   : > { %v744_v28 = vpop.permute.xlu1 %743  ;;  %v734_v29 = vpop.permute.xlu0 %733 }
 0x2c1   : > { %v749_v30 = vpop.permute.xlu1 %748 }
 0x2c2   : > { %v739_v31 = vpop.permute.xlu0 %738 }
 0x2c5   : > { %v835_v32 = vpop.permute.xlu1 %834 }
 0x2c6   : > { %v830_v33 = vpop.permute.xlu0 %829 }
 0x2c9   : > { %v845_v34 = vpop.permute.xlu1 %844 }
 0x2ca   : > { %v840_v35 = vpop.permute.xlu0 %839 }
 0x313   : > { %v2225_v36 = vpop.f32.mrb[0].mxu0 }
 0x314   : > { %v802_v38 = vpop.f32.mrb[1].mxu0  ;;  %v811_v42 = vadd.f32 %v2225_v36, %v744_v28 }
 0x315   : > { %v2233_v37 = vpop.f32.mrb[0].mxu1  ;;  %v2226_v40 = vpop.f32.mrb[2].mxu0  ;;  %v803_v48 = vadd.f32 %v802_v38, %v734_v29 }
 0x316   : > { %v897_v39 = vpop.f32.mrb[1].mxu1  ;;  %v906_v43 = vadd.f32 %v2233_v37, %v840_v35  ;;  %v814_v44 = vadd.f32 %v2226_v40, %v749_v30  ;;  %v805_v46 = vpop.f32.mrb[3].mxu0 }
 0x317   : > { %v2234_v41 = vpop.f32.mrb[2].mxu1  ;;  %v898_v49 = vadd.f32 %v897_v39, %v830_v33  ;;  %v806_v50 = vadd.f32 %v805_v46, %v739_v31 }
 0x318   : > { %v909_v45 = vadd.f32 %v2234_v41, %v845_v34  ;;  %v900_v47 = vpop.f32.mrb[3].mxu1  ;;  %v818_v52 = vpack.c.bf16 %v814_v44, %v811_v42 }
 0x319   : > { %v901_v51 = vadd.f32 %v900_v47, %v835_v32  ;;  %v817_v54 = vpack.c.bf16 %v806_v50, %v803_v48 }
 0x31a   : > { %v913_v53 = vpack.c.bf16 %v909_v45, %v906_v43  ;;  %919 = vst [vmem:[%s917_s21 + $0x10] sm:$0xff] %v818_v52 }
 0x31b   : > { %v912_v55 = vpack.c.bf16 %v901_v51, %v898_v49  ;;  %918 = vst [vmem:[%s917_s21] sm:$0xff] %v817_v54 }
 0x31c   : > { %923 = vst [vmem:[%s921_s5 + $0x10] sm:$0xff] %v913_v53 }
 0x31d   : > { %922 = vst [vmem:[%s921_s5] sm:$0xff] %v912_v55 }
 0x31e PF: > { %s3809_s0 = sld [smem:[#allocation18_spill]]  ;;  %s3226_s19 = sshra.s32 %s2107_s22, 7  ;;  %v934_v56 = vld [vmem:[#allocation2] sm:$0xff]  ;;  %vm942_vm3 = vcmask 261120   ;;  %v935_v59 = vld [vmem:[#allocation2 + $0x8] sm:$0xff]  ;;  %v936_v60 = vld [vmem:[#allocation2 + $0x10] sm:$0xff] }
 0x31f   : > { %s2131_s16 = sshll.u32 %s3226_s19, 3  ;;  %2239 = vmatprep.mubr.msk.bf16.mxu0 %vm942_vm3, %v934_v56  ;;  %v937_v61 = vld [vmem:[#allocation2 + $0x18] sm:$0xff]  ;;  %v938_v62 = vld [vmem:[#allocation2 + $0x20] sm:$0xff]  ;;  %v939_v63 = vld [vmem:[#allocation2 + $0x28] sm:$0xff]  ;;  %v2763_v11 = vmov 0   ;;  %vm1384_vm4 = vcmask 7168  }
 0x320   : > { %s927_s7 = scalar_lea.vmem [#allocation3], %s2131_s16  ;;  %v940_v0 = vld [vmem:[#allocation2 + $0x30] sm:$0xff]  ;;  %v941_v1 = vld [vmem:[#allocation2 + $0x38] sm:$0xff]  ;;  %2450 = vset.pattern.permute.xlu1 %v2763_v11  ;;  %2449 = vset.pattern.permute.xlu0 %v2763_v11  ;;  %v3289_v20 = vld [vmem:[#allocation5] sm:$0xff]  ;;  %s931_s22 = scalar_lea.vmem [#allocation4], %s2131_s16 }
 0x321   : > { %v3287_v19 = vld [vmem:[#allocation5 + $0x10] sm:$0xff]  ;;  %v3295_v25 = vld [vmem:[#allocation5 + $0x18] sm:$0xff]  ;;  %v3300_v26 = vld [vmem:[#allocation5 + $0x8] sm:$0xff] }
 0x322   : > { %v928_v57 = vld [vmem:[%s927_s7] sm:$0xff]  ;;  %v929_v58 = vld [vmem:[%s927_s7 + $0x10] sm:$0xff]  ;;  %v3316_v32 = vld [vmem:[#allocation5 + $0x38] sm:$0xff] }
 0x323   : > { %2235 = vmatprep.subr.bf16.mxu0 %v928_v57  ;;  %v3312_v31 = vld [vmem:[#allocation5 + $0x20] sm:$0xff]  ;;  %v3325_v37 = vld [vmem:[#allocation5 + $0x30] sm:$0xff]  ;;  %v3329_v38 = vld [vmem:[#allocation5 + $0x28] sm:$0xff] }
 0x324   : > { %2236 = vmatpush3.bf16.msra.mxu0 %v928_v57  ;;  %v932_v39 = vld [vmem:[%s931_s22] sm:$0xff]  ;;  %v3344_v45 = vld [vmem:[#allocation5 + $0x58] sm:$0xff]  ;;  %v3353_v50 = vld [vmem:[#allocation5 + $0x50] sm:$0xff]  ;;  %p2141_p5 = scmp.ne.s32.totalorder %s3809_s0, 1 }
 0x325   : > { %2237 = vmatprep.subr.bf16.mxu0 %v929_v58  ;;  %2255 = vmatprep.subr.bf16.mxu1 %v932_v39  ;;  %v3339_v44 = vld [vmem:[#allocation5 + $0x40] sm:$0xff]  ;;  %v3358_v51 = vld [vmem:[#allocation5 + $0x48] sm:$0xff]  ;;  %v933_v52 = vld [vmem:[%s931_s22 + $0x10] sm:$0xff]  ;;  %s3810_s8 = sld [smem:[#allocation37_spill]] (!%p2141_p5)  ;;  %s3811_s7 = sld [smem:[#allocation33_spill]] (!%p2141_p5) }
 0x326   : > { %2256 = vmatpush3.bf16.xpose.msra.mxu1 %v932_v39  ;;  %v3382_v11 = vld [vmem:[#allocation5 + $0x70] sm:$0xff] }
 0x327   : > { %2257 = vmatprep.subr.bf16.mxu1 %v933_v52 }
 0x328   : > { %2238 = vmatpush3.bf16.msra.mxu0 %v929_v58  ;;  %v3367_v58 = vld [vmem:[#allocation5 + $0x60] sm:$0xff] }
 0x32b   : > { %2240 = vmatmul.mubr.msk.bf16.vlgmr.msra.gmra.mrb[0].mxu0 %vm942_vm3, %v935_v59  ;;  %v3371_v59 = vld [vmem:[#allocation5 + $0x78] sm:$0xff] }
 0x32c   : > { %2243 = vmatprep.mubr.msk.bf16.mxu0 %vm942_vm3, %v936_v60 }
 0x32e   : > { %2258 = vmatpush3.bf16.xpose.msra.mxu1 %v933_v52 }
 0x333   : > { %2244 = vmatmul.mubr.msk.bf16.gmra.mrb[4].mxu0 %vm942_vm3, %v937_v61 }
 0x334   : > { %2247 = vmatprep.mubr.msk.bf16.mxu0 %vm942_vm3, %v938_v62 }
 0x33b   : > { %2248 = vmatmul.mubr.msk.bf16.gmra.mrb[8].mxu0 %vm942_vm3, %v939_v63 }
 0x33c   : > { %2251 = vmatprep.mubr.msk.bf16.mxu0 %vm942_vm3, %v940_v0 }
 0x343   : > { %2252 = vmatmul.mubr.msk.bf16.gmra.mrb[12].mxu0 %vm942_vm3, %v941_v1 }
 0x3fe   : > { %v3239_v2 = vpop.f32.mrb[0].mxu0 }
 0x3ff   : > { %1084 = vmax.xlane.f32.xlu1 %v3239_v2  ;;  %v3242_v3 = vpop.f32.mrb[1].mxu0 }
 0x400   : > { %1080 = vmax.xlane.f32.xlu0 %v3242_v3  ;;  %v3245_v4 = vpop.f32.mrb[2].mxu0 }
 0x401   : > { %v3247_v5 = vpop.f32.mrb[3].mxu0 }
 0x403   : > { %1086 = vmax.xlane.f32.xlu1 %v3245_v4 }
 0x404   : > { %1082 = vmax.xlane.f32.xlu0 %v3247_v5 }
 0x406   : > { %v3251_v6 = vpop.f32.mrb[4].mxu0 }
 0x407   : > { %v3253_v7 = vpop.f32.mrb[5].mxu0 }
 0x408   : > { %1088 = vmax.xlane.f32.xlu0 %v3253_v7  ;;  %v3256_v8 = vpop.f32.mrb[6].mxu0 }
 0x409   : > { %1094 = vmax.xlane.f32.xlu1 %v3256_v8  ;;  %v3259_v9 = vpop.f32.mrb[7].mxu0 }
 0x40c   : > { %1092 = vmax.xlane.f32.xlu0 %v3251_v6 }
 0x40d   : > { %1090 = vmax.xlane.f32.xlu1 %v3259_v9 }
 0x40e   : > { %v3263_v10 = vpop.f32.mrb[8].mxu0 }
 0x40f   : > { %v3265_v12 = vpop.f32.mrb[9].mxu0 }
 0x410   : > { %v3267_v13 = vpop.f32.mrb[10].mxu0  ;;  %1096 = vmax.xlane.f32.xlu0 %v3265_v12 }
 0x411   : > { %1102 = vmax.xlane.f32.xlu1 %v3267_v13  ;;  %v3271_v14 = vpop.f32.mrb[11].mxu0 }
 0x414   : > { %1100 = vmax.xlane.f32.xlu0 %v3263_v10 }
 0x415   : > { %1098 = vmax.xlane.f32.xlu1 %v3271_v14 }
 0x416   : > { %v3275_v15 = vpop.f32.mrb[12].mxu0 }
 0x417   : > { %v3277_v16 = vpop.f32.mrb[13].mxu0 }
 0x418   : > { %v3279_v17 = vpop.f32.mrb[14].mxu0  ;;  %1104 = vmax.xlane.f32.xlu0 %v3277_v16 }
 0x419   : > { %1110 = vmax.xlane.f32.xlu1 %v3279_v17  ;;  %v3283_v18 = vpop.f32.mrb[15].mxu0 }
 0x41c   : > { %1108 = vmax.xlane.f32.xlu0 %v3275_v15 }
 0x41d   : > { %1106 = vmax.xlane.f32.xlu1 %v3283_v18 }
 0x48c   : > { %v1085_v21 = vpop.xlane.xlu1 %1084 }
 0x48d   : > { %v3292_v22 = vmax.f32 %v3287_v19, %v1085_v21  ;;  %v1081_v23 = vpop.xlane.xlu0 %1080 }
 0x48e   : > { %v1112_v24 = vmax.f32 %v3289_v20, %v1081_v23 }
 0x48f   : > { %1652 = vst.msk [vmem:[#allocation5 + $0x10] sm:$0xff] %vm1384_vm4, %v3292_v22  ;;  %1188 = vperm.xlu1 %2450, %v3292_v22  }
 0x490   : > { %1650 = vst.msk [vmem:[#allocation5] sm:$0xff] %vm1384_vm4, %v1112_v24  ;;  %v1087_v27 = vpop.xlane.xlu1 %1086  ;;  %1178 = vperm.xlu0 %2449, %v1112_v24   ;;  %v1128_v54 = vsub.f32 %v3289_v20, %v1112_v24  ;;  %v1077_v20 = vld [vmem:[#allocation5 + $0x68] sm:$0xff] }
 0x491   : > { %v3304_v28 = vmax.f32 %v3295_v25, %v1087_v27  ;;  %v1083_v29 = vpop.xlane.xlu0 %1082 }
 0x492   : > { %v3307_v30 = vmax.f32 %v3300_v26, %v1083_v29  ;;  %v1144_v61 = vmul.f32 1.442695, %v1128_v54 }
 0x493   : > { %1653 = vst.msk [vmem:[#allocation5 + $0x18] sm:$0xff] %vm1384_vm4, %v3304_v28  ;;  %1193 = vperm.xlu1 %2450, %v3304_v28   ;;  %v1131_v62 = vsub.f32 %v3295_v25, %v3304_v28 }
 0x494   : > { %1651 = vst.msk [vmem:[#allocation5 + $0x8] sm:$0xff] %vm1384_vm4, %v3307_v30  ;;  %v1129_v21 = vsub.f32 %v3300_v26, %v3307_v30  ;;  %2451 = vpow2.f32 %v1144_v61 }
 0x495   : > { %v1089_v33 = vpop.xlane.xlu0 %1088  ;;  %v1150_v25 = vmul.f32 1.442695, %v1131_v62 }
 0x496   : > { %v3319_v34 = vmax.f32 %v3312_v31, %v1089_v33  ;;  %v1095_v35 = vpop.xlane.xlu1 %1094 }
 0x497   : > { %v3322_v36 = vmax.f32 %v3316_v32, %v1095_v35  ;;  %1183 = vperm.xlu1 %2450, %v3307_v30   ;;  %v1130_v30 = vsub.f32 %v3287_v19, %v3292_v22  ;;  %v1146_v35 = vmul.f32 1.442695, %v1129_v21  ;;  %2453 = vpow2.f32 %v1150_v25 }
 0x498   : > { %1654 = vst.msk [vmem:[#allocation5 + $0x20] sm:$0xff] %vm1384_vm4, %v3319_v34 }
 0x499   : > { %1657 = vst.msk [vmem:[#allocation5 + $0x38] sm:$0xff] %vm1384_vm4, %v3322_v36  ;;  %v1093_v40 = vpop.xlane.xlu0 %1092  ;;  %2455 = vpow2.f32 %v1146_v35 }
 0x49a   : > { %v3336_v41 = vmax.f32 %v3325_v37, %v1093_v40  ;;  %v1091_v42 = vpop.xlane.xlu1 %1090  ;;  %v1148_v40 = vmul.f32 1.442695, %v1130_v30 }
 0x49b   : > { %v1117_v43 = vmax.f32 %v3329_v38, %v1091_v42  ;;  %v1132_v42 = vsub.f32 %v3312_v31, %v3319_v34 }
 0x49c   : > { %1656 = vst.msk [vmem:[#allocation5 + $0x30] sm:$0xff] %vm1384_vm4, %v3336_v41  ;;  %1208 = vperm.xlu1 %2450, %v3336_v41  }
 0x49d   : > { %1655 = vst.msk [vmem:[#allocation5 + $0x28] sm:$0xff] %vm1384_vm4, %v1117_v43  ;;  %v1097_v46 = vpop.xlane.xlu0 %1096  ;;  %v1133_v27 = vsub.f32 %v3329_v38, %v1117_v43  ;;  %v1135_v38 = vsub.f32 %v3316_v32, %v3322_v36  ;;  %v1152_v32 = vmul.f32 1.442695, %v1132_v42 }
 0x49e   : > { %v1103_v47 = vpop.xlane.xlu1 %1102  ;;  %v3348_v48 = vmax.f32 %v3339_v44, %v1097_v46  ;;  %v3414_v22 = vpop.eup %2451 }
 0x49f   : > { %v3351_v49 = vmax.f32 %v3344_v45, %v1103_v47  ;;  %v1154_v39 = vmul.f32 1.442695, %v1133_v27 }
 0x4a0   : > { %1658 = vst.msk [vmem:[#allocation5 + $0x40] sm:$0xff] %vm1384_vm4, %v3348_v48  ;;  %1198 = vperm.xlu1 %2450, %v3319_v34  }
 0x4a1   : > { %1661 = vst.msk [vmem:[#allocation5 + $0x58] sm:$0xff] %vm1384_vm4, %v3351_v49  ;;  %v1101_v53 = vpop.xlane.xlu0 %1100  ;;  %2457 = vpow2.f32 %v1154_v39  ;;  %v1139_v19 = vsub.f32 %v3344_v45, %v3351_v49  ;;  %v3421_v46 = vpop.eup %2453 }
 0x4a2   : > { %v1099_v55 = vpop.xlane.xlu1 %1098  ;;  %v3364_v56 = vmax.f32 %v3353_v50, %v1101_v53  ;;  %2459 = vpow2.f32 %v1148_v40 }
 0x4a3   : > { %v1121_v57 = vmax.f32 %v3358_v51, %v1099_v55  ;;  %v1166_v31 = vmul.f32 1.442695, %v1139_v19 }
 0x4a4   : > { %1660 = vst.msk [vmem:[#allocation5 + $0x50] sm:$0xff] %vm1384_vm4, %v3364_v56  ;;  %1203 = vperm.xlu1 %2450, %v1117_v43   ;;  %v1158_v43 = vmul.f32 1.442695, %v1135_v38  ;;  %v1138_v47 = vsub.f32 %v3353_v50, %v3364_v56 }
 0x4a5   : > { %1659 = vst.msk [vmem:[#allocation5 + $0x48] sm:$0xff] %vm1384_vm4, %v1121_v57  ;;  %1223 = vperm.xlu0 %2449, %v1121_v57   ;;  %v1105_v60 = vpop.xlane.xlu0 %1104  ;;  %v1137_v34 = vsub.f32 %v3358_v51, %v1121_v57  ;;  %v1136_v51 = vsub.f32 %v3339_v44, %v3348_v48 }
 0x4a6   : > { %v1111_v63 = vpop.xlane.xlu1 %1110  ;;  %v3377_v0 = vmax.f32 %v3367_v58, %v1105_v60  ;;  %2461 = vpow2.f32 %v1158_v43  ;;  %v1164_v53 = vmul.f32 1.442695, %v1138_v47 }
 0x4a7   : > { %v3380_v1 = vmax.f32 %v3371_v59, %v1111_v63  ;;  %2463 = vpow2.f32 %v1152_v32 }
 0x4a8   : > { %1662 = vst.msk [vmem:[#allocation5 + $0x60] sm:$0xff] %vm1384_vm4, %v3377_v0  ;;  %1213 = vperm.xlu1 %2450, %v3322_v36   ;;  %v1134_v36 = vsub.f32 %v3325_v37, %v3336_v41  ;;  %2465 = vpow2.f32 %v1166_v31  ;;  %v3427_v41 = vpop.eup %2455  ;;  %v1140_v57 = vsub.f32 %v3367_v58, %v3377_v0 }
 0x4a9   : > { %v1143_v23 = vsub.f32 %v3371_v59, %v3380_v1  ;;  %1665 = vst.msk [vmem:[#allocation5 + $0x78] sm:$0xff] %vm1384_vm4, %v3380_v1  ;;  %1233 = vperm.xlu0 %2449, %v3351_v49   ;;  %v1109_v24 = vpop.xlane.xlu0 %1108  ;;  %v1162_v49 = vmul.f32 1.442695, %v1137_v34 }
 0x4aa   : > { %v1107_v28 = vpop.xlane.xlu1 %1106  ;;  %v3396_v29 = vmax.f32 %v3382_v11, %v1109_v24  ;;  %v1156_v45 = vmul.f32 1.442695, %v1134_v36  ;;  %v1168_v60 = vmul.f32 1.442695, %v1140_v57 }
 0x4ab   : > { %v1125_v33 = vmax.f32 %v1077_v20, %v1107_v28  ;;  %v3429_v52 = vpop.eup %2457 }
 0x4ac   : > { %v1142_v26 = vsub.f32 %v3382_v11, %v3396_v29  ;;  %1664 = vst.msk [vmem:[#allocation5 + $0x70] sm:$0xff] %vm1384_vm4, %v3396_v29  ;;  %1218 = vperm.xlu1 %2450, %v3348_v48   ;;  %2467 = vpow2.f32 %v1156_v45  ;;  %v3435_v54 = vpop.eup %2459 }
 0x4ad   : > { %1663 = vst.msk [vmem:[#allocation5 + $0x68] sm:$0xff] %vm1384_vm4, %v1125_v33  ;;  %1243 = vperm.xlu0 %2449, %v1125_v33   ;;  %v1141_v37 = vsub.f32 %v1077_v20, %v1125_v33  ;;  %2469 = vpow2.f32 %v1162_v49 }
 0x4ae   : > { %2471 = vpow2.f32 %v1164_v53 }
 0x4af   : > { %v1170_v50 = vmul.f32 1.442695, %v1141_v37 }
 0x4b0   : > { %1228 = vperm.xlu1 %2450, %v3364_v56   ;;  %v3437_v55 = vpop.eup %2461  ;;  %v1160_v56 = vmul.f32 1.442695, %v1136_v51 }
 0x4b1   : > { %1253 = vperm.xlu0 %2449, %v3380_v1   ;;  %2473 = vpow2.f32 %v1170_v50  ;;  %v3443_v44 = vpop.eup %2463 }
 0x4b2   : > { %v3445_v48 = vpop.eup %2465  ;;  %2475 = vpow2.f32 %v1160_v56 }
 0x4b3   : > { %2477 = vpow2.f32 %v1168_v60 }
 0x4b4   : > { %1238 = vperm.xlu1 %2450, %v3377_v0  }
 0x4b5   : > { %1524 = vperm.xlu0 %2449, %v3414_v22  }
 0x4b6   : > { %v3449_v61 = vpop.eup %2467 }
 0x4b7   : > { %v3451_v62 = vpop.eup %2469 }
 0x4b8   : > { %1248 = vperm.xlu1 %2450, %v3396_v29   ;;  %v3455_v58 = vpop.eup %2471 }
 0x4b9   : > { %1539 = vperm.xlu0 %2449, %v3421_v46  }
 0x4bb   : > { %v3457_v63 = vpop.eup %2473 }
 0x4bc   : > { %1529 = vperm.xlu1 %2450, %v3427_v41   ;;  %v3461_v0 = vpop.eup %2475 }
 0x4bd   : > { %1549 = vperm.xlu0 %2449, %v3429_v52   ;;  %v3464_v20 = vpop.eup %2477 }
 0x4c0   : > { %1534 = vperm.xlu1 %2450, %v3435_v54  }
 0x4c1   : > { %1559 = vperm.xlu0 %2449, %v3437_v55  }
 0x4c4   : > { %1544 = vperm.xlu1 %2450, %v3443_v44  }
 0x4c5   : > { %1579 = vperm.xlu0 %2449, %v3445_v48  }
 0x4c8   : > { %1554 = vperm.xlu1 %2450, %v3449_v61  }
 0x4c9   : > { %1569 = vperm.xlu0 %2449, %v3451_v62  }
 0x4cc   : > { %1574 = vperm.xlu1 %2450, %v3455_v58  }
 0x4cd   : > { %1589 = vperm.xlu0 %2449, %v3457_v63  }
 0x4d0   : > { %1564 = vperm.xlu1 %2450, %v3461_v0  }
 0x4d4   : > { %1584 = vperm.xlu1 %2450, %v3464_v20  }
 0x50e   : > { %v1189_v21 = vpop.permute.xlu1 %1188 }
 0x50f   : > { %v1258_v24 = vsub.f32 %v3239_v2, %v1189_v21  ;;  %v1179_v25 = vpop.permute.xlu0 %1178 }
 0x510   : > { %v1256_v27 = vsub.f32 %v3242_v3, %v1179_v25 }
 0x511   : > { %v1276_v28 = vmul.f32 1.442695, %v1258_v24 }
 0x512   : > { %v1272_v33 = vmul.f32 1.442695, %v1256_v27  ;;  %v1194_v30 = vpop.permute.xlu1 %1193 }
 0x513   : > { %2479 = vpow2.f32 %v1276_v28  ;;  %v1259_v35 = vsub.f32 %v3245_v4, %v1194_v30 }
 0x514   : > { %2481 = vpow2.f32 %v1272_v33 }
 0x515   : > { %v1278_v38 = vmul.f32 1.442695, %v1259_v35 }
 0x516   : > { %v1184_v39 = vpop.permute.xlu1 %1183 }
 0x517   : > { %2483 = vpow2.f32 %v1278_v38  ;;  %v1257_v40 = vsub.f32 %v3247_v5, %v1184_v39 }
 0x519   : > { %v1274_v42 = vmul.f32 1.442695, %v1257_v40 }
 0x51b   : > { %2485 = vpow2.f32 %v1274_v42  ;;  %v1209_v43 = vpop.permute.xlu1 %1208 }
 0x51c   : > { %v1262_v2 = vsub.f32 %v3251_v6, %v1209_v43 }
 0x51d   : > { %v2480_v19 = vpop.eup %2479 }
 0x51e   : > { %v2482_v32 = vpop.eup %2481  ;;  %v1284_v3 = vmul.f32 1.442695, %v1262_v2  ;;  %1340 = vadd.xlane.f32.xlu0 %v2480_v19 }
 0x51f   : > { %1336 = vadd.xlane.f32.xlu1 %v2482_v32  ;;  %v1199_v36 = vpop.permute.xlu1 %1198 }
 0x520   : > { %2487 = vpow2.f32 %v1284_v3  ;;  %v1260_v4 = vsub.f32 %v3253_v7, %v1199_v36 }
 0x521   : > { %v2484_v31 = vpop.eup %2483 }
 0x522   : > { %v1280_v34 = vmul.f32 1.442695, %v1260_v4  ;;  %v1402_v45 = vpack.c.bf16 %v2484_v31, %v2480_v19 }
 0x523   : > { %1342 = vadd.xlane.f32.xlu1 %v2484_v31  ;;  %v1204_v47 = vpop.permute.xlu1 %1203 }
 0x524   : > { %2489 = vpow2.f32 %v1280_v34  ;;  %v1261_v5 = vsub.f32 %v3259_v9, %v1204_v47  ;;  %v1224_v49 = vpop.permute.xlu0 %1223 }
 0x525   : > { %v2486_v37 = vpop.eup %2485  ;;  %v1265_v53 = vsub.f32 %v3271_v14, %v1224_v49 }
 0x526   : > { %v1282_v6 = vmul.f32 1.442695, %v1261_v5  ;;  %1338 = vadd.xlane.f32.xlu0 %v2486_v37  ;;  %v1401_v51 = vpack.c.bf16 %v2486_v37, %v2482_v32 }
 0x527   : > { %v1214_v50 = vpop.permute.xlu1 %1213  ;;  %v1290_v21 = vmul.f32 1.442695, %v1265_v53  ;;  %v1172_v53 = vmul.f32 1.442695, %v1142_v26 }
 0x528   : > { %2491 = vpow2.f32 %v1282_v6  ;;  %v1263_v56 = vsub.f32 %v3256_v8, %v1214_v50  ;;  %v1234_v7 = vpop.permute.xlu0 %1233  ;;  %2259 = vmatprep.mubr.bf16.mxu1 %v1401_v51  ;;  %v1174_v50 = vmul.f32 1.442695, %v1143_v23 }
 0x529   : > { %2260 = vmatmul.mubr.bf16.vlgmr.msra.gmra.mrb[0].mxu1 %v1402_v45  ;;  %v1267_v24 = vsub.f32 %v3267_v13, %v1234_v7 }
 0x52a   : > { %v2488_v57 = vpop.eup %2487  ;;  %v1286_v60 = vmul.f32 1.442695, %v1263_v56 }
 0x52b   : > { %1348 = vadd.xlane.f32.xlu0 %v2488_v57  ;;  %v1219_v9 = vpop.permute.xlu1 %1218  ;;  %v1294_v33 = vmul.f32 1.442695, %v1267_v24 }
 0x52c   : > { %2493 = vpow2.f32 %v1286_v60  ;;  %v1264_v25 = vsub.f32 %v3265_v12, %v1219_v9  ;;  %v1244_v27 = vpop.permute.xlu0 %1243 }
 0x52d   : > { %2495 = vpow2.f32 %v1290_v21  ;;  %v1269_v8 = vsub.f32 %v3283_v18, %v1244_v27 }
 0x52e   : > { %v2490_v28 = vpop.eup %2489  ;;  %v1288_v14 = vmul.f32 1.442695, %v1264_v25 }
 0x52f   : > { %1344 = vadd.xlane.f32.xlu0 %v2490_v28  ;;  %v1229_v30 = vpop.permute.xlu1 %1228  ;;  %v1298_v40 = vmul.f32 1.442695, %v1269_v8 }
 0x530   : > { %2497 = vpow2.f32 %v1288_v14  ;;  %v1266_v35 = vsub.f32 %v3263_v10, %v1229_v30  ;;  %v1254_v38 = vpop.permute.xlu0 %1253 }
 0x531   : > { %2499 = vpow2.f32 %v1294_v33  ;;  %v1271_v42 = vsub.f32 %v3279_v17, %v1254_v38  ;;  %v1304_v33 = vld [vmem:[#allocation6] sm:$0xff] }
 0x532   : > { %v2492_v39 = vpop.eup %2491  ;;  %v1292_v13 = vmul.f32 1.442695, %v1266_v35  ;;  %v1320_v35 = vmul.f32 %v3414_v22, %v1304_v33  ;;  %v1310_v22 = vld [vmem:[#allocation6 + $0x30] sm:$0xff] }
 0x533   : > { %v1239_v12 = vpop.permute.xlu1 %1238  ;;  %v1403_v43 = vpack.c.bf16 %v2492_v39, %v2490_v28  ;;  %v1302_v32 = vmul.f32 1.442695, %v1271_v42  ;;  %v1306_v28 = vld [vmem:[#allocation6 + $0x10] sm:$0xff] }
 0x534   : > { %2501 = vpow2.f32 %v1292_v13  ;;  %v1268_v2 = vsub.f32 %v3277_v16, %v1239_v12  ;;  %v1322_v8 = vmul.f32 %v3435_v54, %v1306_v28  ;;  %v1307_v13 = vld [vmem:[#allocation6 + $0x18] sm:$0xff]  ;;  %v1305_v12 = vld [vmem:[#allocation6 + $0x8] sm:$0xff] }
 0x535   : > { %2263 = vmatprep.mubr.bf16.mxu1 %v1403_v43  ;;  %2503 = vpow2.f32 %v1298_v40  ;;  %v1323_v42 = vmul.f32 %v3421_v46, %v1307_v13 }
 0x536   : > { %v2494_v19 = vpop.eup %2493  ;;  %v1296_v18 = vmul.f32 1.442695, %v1268_v2 }
 0x537   : > { %1350 = vadd.xlane.f32.xlu1 %v2494_v19  ;;  %v1249_v3 = vpop.permute.xlu1 %1248  ;;  %v1404_v10 = vpack.c.bf16 %v2494_v19, %v2488_v57  ;;  %v2496_v4 = vpop.eup %2495  ;;  %v1321_v19 = vmul.f32 %v3427_v41, %v1305_v12  ;;  %v1311_v41 = vld [vmem:[#allocation6 + $0x38] sm:$0xff]  ;;  %v1316_v12 = vld [vmem:[#allocation6 + $0x60] sm:$0xff] }
 0x538   : > { %2505 = vpow2.f32 %v1296_v18  ;;  %v1270_v36 = vsub.f32 %v3275_v15, %v1249_v3  ;;  %v3495_v57 = vpop.permute.xlu0 %1524 }
 0x539   : > { %2264 = vmatmul.mubr.bf16.gmra.mrb[4].mxu1 %v1404_v10  ;;  %2507 = vpow2.f32 %v1302_v32  ;;  %v1326_v32 = vmul.f32 %v3449_v61, %v1310_v22  ;;  %v1308_v10 = vld [vmem:[#allocation6 + $0x20] sm:$0xff] }
 0x53a   : > { %v2498_v31 = vpop.eup %2497  ;;  %v1300_v17 = vmul.f32 1.442695, %v1270_v36  ;;  %v1324_v46 = vmul.f32 %v3443_v44, %v1308_v10  ;;  %v1507_v10 = vld [vmem:[#allocation7 + $0x8] sm:$0xff] }
 0x53b   : > { %1346 = vadd.xlane.f32.xlu1 %v2492_v39  ;;  %v1405_v34 = vpack.c.bf16 %v2496_v4, %v2498_v31  ;;  %v2500_v16 = vpop.eup %2499  ;;  %v3497_v60 = vpop.permute.xlu1 %1529 }
 0x53c   : > { %2509 = vpow2.f32 %v1300_v17  ;;  %v3499_v11 = vpop.permute.xlu0 %1539  ;;  %v1327_v17 = vmul.f32 %v3437_v55, %v1311_v41  ;;  %v1312_v55 = vld [vmem:[#allocation6 + $0x40] sm:$0xff]  ;;  %v1603_v41 = vmul.f32 %v3497_v60, %v1507_v10 }
 0x53d   : > { %2267 = vmatprep.mubr.bf16.mxu1 %v1405_v34  ;;  %2511 = vpow2.f32 %v1172_v53  ;;  %v1313_v53 = vld [vmem:[#allocation6 + $0x48] sm:$0xff] }
 0x53e   : > { %v2502_v45 = vpop.eup %2501  ;;  %2513 = vpow2.f32 %v1174_v50  ;;  %v1329_v33 = vmul.f32 %v3451_v62, %v1313_v53 }
 0x53f   : > { %1358 = vadd.xlane.f32.xlu1 %v2500_v16  ;;  %1356 = vadd.xlane.f32.xlu0 %v2502_v45  ;;  %v1406_v47 = vpack.c.bf16 %v2500_v16, %v2502_v45  ;;  %v2504_v5 = vpop.eup %2503  ;;  %v3501_v29 = vpop.permute.xlu1 %1534  ;;  %v1309_v16 = vld [vmem:[#allocation6 + $0x28] sm:$0xff] }
 0x540   : > { %v3503_v26 = vpop.permute.xlu0 %1549  ;;  %v1325_v61 = vmul.f32 %v3429_v52, %v1309_v16  ;;  %v1328_v52 = vmul.f32 %v3461_v0, %v1312_v55  ;;  %v1317_v0 = vld [vmem:[#allocation6 + $0x68] sm:$0xff] }
 0x541   : > { %2268 = vmatmul.mubr.bf16.gmra.mrb[8].mxu1 %v1406_v47 }
 0x542   : > { %v2506_v49 = vpop.eup %2505 }
 0x543   : > { %1354 = vadd.xlane.f32.xlu1 %v2496_v4  ;;  %1352 = vadd.xlane.f32.xlu0 %v2498_v31  ;;  %v1407_v15 = vpack.c.bf16 %v2504_v5, %v2506_v49  ;;  %v2508_v37 = vpop.eup %2507  ;;  %v3505_v59 = vpop.permute.xlu1 %1544 }
 0x544   : > { %v3507_v1 = vpop.permute.xlu0 %1559 }
 0x545   : > { %2271 = vmatprep.mubr.bf16.mxu1 %v1407_v15 }
 0x546   : > { %v2510_v6 = vpop.eup %2509 }
 0x547   : > { %1366 = vadd.xlane.f32.xlu1 %v2508_v37  ;;  %1364 = vadd.xlane.f32.xlu0 %v2510_v6  ;;  %v1408_v51 = vpack.c.bf16 %v2508_v37, %v2510_v6  ;;  %v3489_v56 = vpop.eup %2511  ;;  %v3509_v23 = vpop.permute.xlu1 %1554 }
 0x548   : > { %v3492_v7 = vpop.eup %2513  ;;  %v3511_v21 = vpop.permute.xlu0 %1579 }
 0x549   : > { %2272 = vmatmul.mubr.bf16.gmra.mrb[12].mxu1 %v1408_v51 }
 0x54b   : > { %1362 = vadd.xlane.f32.xlu1 %v2504_v5  ;;  %1360 = vadd.xlane.f32.xlu0 %v2506_v49  ;;  %v3513_v24 = vpop.permute.xlu1 %1574  ;;  %v1314_v5 = vld [vmem:[#allocation6 + $0x50] sm:$0xff]  ;;  %v1315_v49 = vld [vmem:[#allocation6 + $0x58] sm:$0xff] }
 0x54c   : > { %v3515_v9 = vpop.permute.xlu0 %1569  ;;  %v1330_v44 = vmul.f32 %v3455_v58, %v1314_v5  ;;  %v1331_v37 = vmul.f32 %v3445_v48, %v1315_v49  ;;  %v1319_v58 = vld [vmem:[#allocation6 + $0x78] sm:$0xff] }
 0x54d   : > { %v1335_v13 = vmul.f32 %v3492_v7, %v1319_v58 }
 0x54f   : > { %v3517_v25 = vpop.permute.xlu1 %1564 }
 0x550   : > { %v3519_v27 = vpop.permute.xlu0 %1589 }
 0x553   : > { %v3521_v14 = vpop.permute.xlu1 %1584 }
 0x55c   : > { %1594 = vperm.xlu1 %2450, %v3489_v56  }
 0x561   : > { %1599 = vperm.xlu0 %2449, %v3492_v7   ;;  %v1508_v7 = vld [vmem:[#allocation7 + $0x10] sm:$0xff] }
 0x5ab   : > { %v1341_v30 = vpop.xlane.xlu0 %1340 }
 0x5ac   : > { %v1370_v38 = vadd.f32 %v1341_v30, %v1322_v8  ;;  %v1337_v39 = vpop.xlane.xlu1 %1336 }
 0x5ad   : > { %v1368_v40 = vadd.f32 %v1337_v39, %v1320_v35  ;;  %v1318_v35 = vld [vmem:[#allocation6 + $0x70] sm:$0xff] }
 0x5ae   : > { %1387 = vst.msk [vmem:[#allocation6 + $0x10] sm:$0xff] %vm1384_vm4, %v1370_v38  ;;  %v1334_v39 = vmul.f32 %v3489_v56, %v1318_v35 }
 0x5af   : > { %1385 = vst.msk [vmem:[#allocation6] sm:$0xff] %vm1384_vm4, %v1368_v40 }
 0x5b0   : > { %v1343_v43 = vpop.xlane.xlu1 %1342 }
 0x5b1   : > { %v1371_v2 = vadd.f32 %v1343_v43, %v1323_v42 }
 0x5b3   : > { %1388 = vst.msk [vmem:[#allocation6 + $0x18] sm:$0xff] %vm1384_vm4, %v1371_v2  ;;  %v1339_v54 = vpop.xlane.xlu0 %1338  ;;  %v1332_v2 = vmul.f32 %v3464_v20, %v1316_v12 }
 0x5b4   : > { %v1369_v18 = vadd.f32 %v1339_v54, %v1321_v19  ;;  %v1333_v19 = vmul.f32 %v3457_v63, %v1317_v0  ;;  %v1518_v0 = vld [vmem:[#allocation7 + $0x60] sm:$0xff] }
 0x5b6   : > { %1386 = vst.msk [vmem:[#allocation6 + $0x8] sm:$0xff] %vm1384_vm4, %v1369_v18 }
 0x5b8   : > { %v1349_v3 = vpop.xlane.xlu0 %1348 }
 0x5b9   : > { %v1374_v36 = vadd.f32 %v1349_v3, %v1326_v32  ;;  %v1506_v32 = vld [vmem:[#allocation7] sm:$0xff]  ;;  %v1509_v3 = vld [vmem:[#allocation7 + $0x18] sm:$0xff] }
 0x5ba   : > { %v1605_v20 = vmul.f32 %v3499_v11, %v1509_v3  ;;  %v1513_v11 = vld [vmem:[#allocation7 + $0x38] sm:$0xff] }
 0x5bb   : > { %1391 = vst.msk [vmem:[#allocation6 + $0x30] sm:$0xff] %vm1384_vm4, %v1374_v36  ;;  %v1604_v36 = vmul.f32 %v3501_v29, %v1508_v7  ;;  %v1510_v29 = vld [vmem:[#allocation7 + $0x20] sm:$0xff] }
 0x5bc   : > { %v1345_v4 = vpop.xlane.xlu0 %1344  ;;  %v1606_v60 = vmul.f32 %v3505_v59, %v1510_v29  ;;  %v1517_v59 = vld [vmem:[#allocation7 + $0x58] sm:$0xff] }
 0x5bd   : > { %v1372_v31 = vadd.f32 %v1345_v4, %v1324_v46  ;;  %v1602_v46 = vmul.f32 %v3495_v57, %v1506_v32  ;;  %v1512_v57 = vld [vmem:[#allocation7 + $0x30] sm:$0xff] }
 0x5be   : > { %v1608_v5 = vmul.f32 %v3509_v23, %v1512_v57  ;;  %v1514_v23 = vld [vmem:[#allocation7 + $0x40] sm:$0xff] }
 0x5bf   : > { %1389 = vst.msk [vmem:[#allocation6 + $0x20] sm:$0xff] %vm1384_vm4, %v1372_v31 }
 0x5c4   : > { %v1351_v34 = vpop.xlane.xlu1 %1350 }
 0x5c5   : > { %v1375_v45 = vadd.f32 %v1351_v34, %v1327_v17 }
 0x5c7   : > { %1392 = vst.msk [vmem:[#allocation6 + $0x38] sm:$0xff] %vm1384_vm4, %v1375_v45 }
 0x5c8   : > { %v1347_v47 = vpop.xlane.xlu1 %1346 }
 0x5c9   : > { %v1373_v15 = vadd.f32 %v1347_v47, %v1325_v61  ;;  %v1511_v47 = vld [vmem:[#allocation7 + $0x28] sm:$0xff] }
 0x5cb   : > { %1390 = vst.msk [vmem:[#allocation6 + $0x28] sm:$0xff] %vm1384_vm4, %v1373_v15  ;;  %v1609_v15 = vmul.f32 %v3507_v1, %v1513_v11  ;;  %v1515_v1 = vld [vmem:[#allocation7 + $0x48] sm:$0xff] }
 0x5cc   : > { %v1357_v6 = vpop.xlane.xlu0 %1356  ;;  %v1359_v51 = vpop.xlane.xlu1 %1358 }
 0x5cd   : > { %v1378_v50 = vadd.f32 %v1357_v6, %v1330_v44  ;;  %v1379_v28 = vadd.f32 %v1359_v51, %v1331_v37  ;;  %v1607_v6 = vmul.f32 %v3503_v26, %v1511_v47  ;;  %v1610_v26 = vmul.f32 %v3517_v25, %v1514_v23  ;;  %v1521_v25 = vld [vmem:[#allocation7 + $0x78] sm:$0xff] }
 0x5cf   : > { %1395 = vst.msk [vmem:[#allocation6 + $0x50] sm:$0xff] %vm1384_vm4, %v1378_v50  ;;  %1396 = vst.msk [vmem:[#allocation6 + $0x58] sm:$0xff] %vm1384_vm4, %v1379_v28  ;;  %v1516_v28 = vld [vmem:[#allocation7 + $0x50] sm:$0xff] }
 0x5d0   : > { %v1353_v8 = vpop.xlane.xlu0 %1352  ;;  %v1355_v30 = vpop.xlane.xlu1 %1354 }
 0x5d1   : > { %v1376_v38 = vadd.f32 %v1353_v8, %v1328_v52  ;;  %v1377_v48 = vadd.f32 %v1355_v30, %v1329_v33  ;;  %v1612_v33 = vmul.f32 %v3513_v24, %v1516_v28  ;;  %v1613_v30 = vmul.f32 %v3511_v21, %v1517_v59 }
 0x5d3   : > { %1393 = vst.msk [vmem:[#allocation6 + $0x40] sm:$0xff] %vm1384_vm4, %v1376_v38  ;;  %1394 = vst.msk [vmem:[#allocation6 + $0x48] sm:$0xff] %vm1384_vm4, %v1377_v48  ;;  %v1611_v38 = vmul.f32 %v3515_v9, %v1515_v1  ;;  %v1827_v1 = vld [vmem:[%s3810_s8 + $0x8] sm:$0xff] (!%p2141_p5) }
 0x5d4   : > { %v1365_v40 = vpop.xlane.xlu0 %1364  ;;  %v1367_v42 = vpop.xlane.xlu1 %1366 }
 0x5d5   : > { %v1382_v43 = vadd.f32 %v1365_v40, %v1334_v39  ;;  %v1383_v62 = vadd.f32 %v1367_v42, %v1335_v13  ;;  %v1520_v42 = vld [vmem:[#allocation7 + $0x70] sm:$0xff] }
 0x5d6   : > { %v1681_v29 = vld [vmem:[#allocation6 + $0x58] sm:$0xff] (!%p2141_p5)  ;;  %v1680_v47 = vld [vmem:[#allocation6 + $0x50] sm:$0xff] (!%p2141_p5) }
 0x5d7   : > { %1399 = vst.msk [vmem:[#allocation6 + $0x70] sm:$0xff] %vm1384_vm4, %v1382_v43  ;;  %1400 = vst.msk [vmem:[#allocation6 + $0x78] sm:$0xff] %vm1384_vm4, %v1383_v62  ;;  %v1519_v43 = vld [vmem:[#allocation7 + $0x68] sm:$0xff]  ;;  %v1614_v62 = vmul.f32 %v3521_v14, %v1518_v0  ;;  %v1672_v14 = vld [vmem:[#allocation6 + $0x10] sm:$0xff] (!%p2141_p5) }
 0x5d8   : > { %v1361_v54 = vpop.xlane.xlu0 %1360  ;;  %v1363_v18 = vpop.xlane.xlu1 %1362  ;;  %2519 = vrcp.f32 (!%p2141_p5), %v1672_v14 }
 0x5d9   : > { %v1380_v22 = vadd.f32 %v1361_v54, %v1332_v2  ;;  %v1381_v56 = vadd.f32 %v1363_v18, %v1333_v19 }
 0x5db   : > { %1397 = vst.msk [vmem:[#allocation6 + $0x60] sm:$0xff] %vm1384_vm4, %v1380_v22  ;;  %1398 = vst.msk [vmem:[#allocation6 + $0x68] sm:$0xff] %vm1384_vm4, %v1381_v56  ;;  %v1615_v22 = vmul.f32 %v3519_v27, %v1519_v43  ;;  %v2764_v27 = vmov (!%p2141_p5), 0  }
 0x5dc   : > { %v1595_v12 = vpop.permute.xlu1 %1594  ;;  %2516 = vset.pattern.permute.xlu1 (!%p2141_p5), %v2764_v27  ;;  %2515 = vset.pattern.permute.xlu0 (!%p2141_p5), %v2764_v27 }
 0x5dd   : > { %v1616_v9 = vmul.f32 %v1595_v12, %v1520_v42 }
 0x5e0   : > { %v1600_v21 = vpop.permute.xlu0 %1599 }
 0x5e1   : > { %v1617_v19 = vmul.f32 %v1600_v21, %v1521_v25 }
 0x5fc   : > { %v2261_v4 = vpop.f32.mrb[0].mxu1 }
 0x5fd   : > { %v1620_v63 = vadd.f32 %v2261_v4, %v1604_v36  ;;  %v1443_v31 = vpop.f32.mrb[1].mxu1  ;;  %v1670_v36 = vld [vmem:[#allocation6] sm:$0xff] (!%p2141_p5)  ;;  %v1671_v4 = vld [vmem:[#allocation6 + $0x8] sm:$0xff] (!%p2141_p5) }
 0x5fe   : > { %v1618_v17 = vadd.f32 %v1602_v46, %v1443_v31  ;;  %v2262_v34 = vpop.f32.mrb[2].mxu1  ;;  %v1673_v46 = vld [vmem:[#allocation6 + $0x18] sm:$0xff] (!%p2141_p5)  ;;  %2521 = vrcp.f32 (!%p2141_p5), %v1670_v36 }
 0x5ff   : > { %1636 = vst.msk [vmem:[#allocation7 + $0x10] sm:$0xff] %vm942_vm3, %v1620_v63  ;;  %v1621_v16 = vadd.f32 %v2262_v34, %v1605_v20  ;;  %v1446_v45 = vpop.f32.mrb[3].mxu1  ;;  %2523 = vrcp.f32 (!%p2141_p5), %v1673_v46  ;;  %v1675_v20 = vld [vmem:[#allocation6 + $0x28] sm:$0xff] (!%p2141_p5)  ;;  %v1674_v63 = vld [vmem:[#allocation6 + $0x20] sm:$0xff] (!%p2141_p5)  ;;  %v1677_v31 = vld [vmem:[#allocation6 + $0x38] sm:$0xff] (!%p2141_p5) }
 0x600   : > { %1634 = vst.msk [vmem:[#allocation7] sm:$0xff] %vm942_vm3, %v1618_v17  ;;  %v1619_v61 = vadd.f32 %v1603_v41, %v1446_v45  ;;  %2525 = vrcp.f32 (!%p2141_p5), %v1671_v4  ;;  %v1676_v41 = vld [vmem:[#allocation6 + $0x30] sm:$0xff] (!%p2141_p5)  ;;  %v2520_v17 = vpop.eup (!%p2141_p5), %2519 }
 0x601   : > { %1637 = vst.msk [vmem:[#allocation7 + $0x18] sm:$0xff] %vm942_vm3, %v1621_v16  ;;  %2527 = vrcp.f32 (!%p2141_p5), %v1675_v20  ;;  %1730 = vperm.xlu1 (!%p2141_p5), %2516, %v2520_v17   ;;  %v1679_v16 = vld [vmem:[#allocation6 + $0x48] sm:$0xff] (!%p2141_p5) }
 0x602   : > { %1635 = vst.msk [vmem:[#allocation7 + $0x8] sm:$0xff] %vm942_vm3, %v1619_v61  ;;  %2529 = vrcp.f32 (!%p2141_p5), %v1674_v63  ;;  %v1678_v61 = vld [vmem:[#allocation6 + $0x40] sm:$0xff] (!%p2141_p5) }
 0x603   : > { %2531 = vrcp.f32 (!%p2141_p5), %v1677_v31 }
 0x604   : > { %2533 = vrcp.f32 (!%p2141_p5), %v1676_v41 }
 0x605   : > { %2535 = vrcp.f32 (!%p2141_p5), %v1679_v16 }
 0x606   : > { %2537 = vrcp.f32 (!%p2141_p5), %v1678_v61 }
 0x607   : > { %2539 = vrcp.f32 (!%p2141_p5), %v1681_v29 }
 0x608   : > { %v2522_v34 = vpop.eup (!%p2141_p5), %2521  ;;  %2541 = vrcp.f32 (!%p2141_p5), %v1680_v47 }
 0x609   : > { %v2524_v45 = vpop.eup (!%p2141_p5), %2523  ;;  %1720 = vperm.xlu0 (!%p2141_p5), %2515, %v2522_v34  }
 0x60a   : > { %v2526_v57 = vpop.eup (!%p2141_p5), %2525  ;;  %1735 = vperm.xlu1 (!%p2141_p5), %2516, %v2524_v45  }
 0x60b   : > { %v2528_v11 = vpop.eup (!%p2141_p5), %2527 }
 0x60c   : > { %v2265_v49 = vpop.f32.mrb[4].mxu1 }
 0x60d   : > { %v1624_v44 = vadd.f32 %v2265_v49, %v1608_v5  ;;  %v1459_v37 = vpop.f32.mrb[5].mxu1  ;;  %1725 = vperm.xlu0 (!%p2141_p5), %2515, %v2526_v57   ;;  %v2530_v5 = vpop.eup (!%p2141_p5), %2529 }
 0x60e   : > { %v1622_v51 = vadd.f32 %v1606_v60, %v1459_v37  ;;  %v2266_v55 = vpop.f32.mrb[6].mxu1  ;;  %1745 = vperm.xlu1 (!%p2141_p5), %2516, %v2528_v11   ;;  %v1683_v60 = vld [vmem:[#allocation6 + $0x68] sm:$0xff] (!%p2141_p5)  ;;  %v2532_v49 = vpop.eup (!%p2141_p5), %2531  ;;  %v1685_v37 = vld [vmem:[#allocation6 + $0x78] sm:$0xff] (!%p2141_p5) }
 0x60f   : > { %1640 = vst.msk [vmem:[#allocation7 + $0x30] sm:$0xff] %vm942_vm3, %v1624_v44  ;;  %v1625_v53 = vadd.f32 %v2266_v55, %v1609_v15  ;;  %v1462_v50 = vpop.f32.mrb[7].mxu1  ;;  %v1682_v15 = vld [vmem:[#allocation6 + $0x60] sm:$0xff] (!%p2141_p5)  ;;  %v2534_v44 = vpop.eup (!%p2141_p5), %2533  ;;  %2543 = vrcp.f32 (!%p2141_p5), %v1683_v60 }
 0x610   : > { %1638 = vst.msk [vmem:[#allocation7 + $0x20] sm:$0xff] %vm942_vm3, %v1622_v51  ;;  %v1623_v52 = vadd.f32 %v1607_v6, %v1462_v50  ;;  %2545 = vrcp.f32 (!%p2141_p5), %v1682_v15  ;;  %v2536_v6 = vpop.eup (!%p2141_p5), %2535  ;;  %v1684_v51 = vld [vmem:[#allocation6 + $0x70] sm:$0xff] (!%p2141_p5) }
 0x611   : > { %1641 = vst.msk [vmem:[#allocation7 + $0x38] sm:$0xff] %vm942_vm3, %v1625_v53  ;;  %1740 = vperm.xlu0 (!%p2141_p5), %2515, %v2530_v5   ;;  %v2538_v55 = vpop.eup (!%p2141_p5), %2537  ;;  %2547 = vrcp.f32 (!%p2141_p5), %v1685_v37 }
 0x612   : > { %1639 = vst.msk [vmem:[#allocation7 + $0x28] sm:$0xff] %vm942_vm3, %v1623_v52  ;;  %1755 = vperm.xlu1 (!%p2141_p5), %2516, %v2532_v49   ;;  %2549 = vrcp.f32 (!%p2141_p5), %v1684_v51  ;;  %v2540_v53 = vpop.eup (!%p2141_p5), %2539 }
 0x613   : > { %v2542_v50 = vpop.eup (!%p2141_p5), %2541 }
 0x614   : > { %v2269_v8 = vpop.f32.mrb[8].mxu1 }
 0x615   : > { %v1628_v35 = vadd.f32 %v2269_v8, %v1612_v33  ;;  %v1475_v58 = vpop.f32.mrb[9].mxu1  ;;  %1750 = vperm.xlu0 (!%p2141_p5), %2515, %v2534_v44   ;;  %v1826_v33 = vld [vmem:[%s3810_s8] sm:$0xff] (!%p2141_p5)  ;;  %v1828_v8 = vld [vmem:[%s3810_s8 + $0x10] sm:$0xff] (!%p2141_p5) }
 0x616   : > { %v1626_v48 = vadd.f32 %v1610_v26, %v1475_v58  ;;  %v2270_v39 = vpop.f32.mrb[10].mxu1  ;;  %1765 = vperm.xlu1 (!%p2141_p5), %2516, %v2536_v6   ;;  %v1829_v26 = vld [vmem:[%s3810_s8 + $0x18] sm:$0xff] (!%p2141_p5)  ;;  %v1704_v58 = vld [vmem:[#allocation7 + $0x10] sm:$0xff] (!%p2141_p5) }
 0x617   : > { %1644 = vst.msk [vmem:[#allocation7 + $0x50] sm:$0xff] %vm942_vm3, %v1628_v35  ;;  %v1629_v13 = vadd.f32 %v2270_v39, %v1613_v30  ;;  %v1478_v40 = vpop.f32.mrb[11].mxu1  ;;  %v2517_v30 = vld [vmem:[%s3811_s7] sm:$0xff] (!%p2141_p5)  }
 0x618   : > { %1642 = vst.msk [vmem:[#allocation7 + $0x40] sm:$0xff] %vm942_vm3, %v1626_v48  ;;  %v1627_v24 = vadd.f32 %v1611_v38, %v1478_v40  ;;  %2291 = vmatprep.mubr.msk.bf16.mxu0 (!%p2141_p5), %vm942_vm3, %v2517_v30  ;;  %v1705_v48 = vld [vmem:[#allocation7 + $0x18] sm:$0xff] (!%p2141_p5)  ;;  %v1702_v39 = vld [vmem:[#allocation7] sm:$0xff] (!%p2141_p5) }
 0x619   : > { %1645 = vst.msk [vmem:[#allocation7 + $0x58] sm:$0xff] %vm942_vm3, %v1629_v13  ;;  %1760 = vperm.xlu0 (!%p2141_p5), %2515, %v2538_v55   ;;  %v2544_v28 = vpop.eup (!%p2141_p5), %2543  ;;  %v1703_v13 = vld [vmem:[#allocation7 + $0x8] sm:$0xff] (!%p2141_p5) }
 0x61a   : > { %1643 = vst.msk [vmem:[#allocation7 + $0x48] sm:$0xff] %vm942_vm3, %v1627_v24  ;;  %1775 = vperm.xlu1 (!%p2141_p5), %2516, %v2540_v53   ;;  %v2546_v52 = vpop.eup (!%p2141_p5), %2545 }
 0x61b   : > { %v2548_v23 = vpop.eup (!%p2141_p5), %2547 }
 0x61c   : > { %v2273_v2 = vpop.f32.mrb[12].mxu1  ;;  %1669 = sbr.rel (%p2141_p5) target bundleno = 1965 (0x7ad), region = 80  ;;  %v2550_v59 = vpop.eup (!%p2141_p5), %2549 }
 0x61d   : > { %v1632_v54 = vadd.f32 %v2273_v2, %v1616_v9  ;;  %v1491_v18 = vpop.f32.mrb[13].mxu1  ;;  %1770 = vperm.xlu0 (!%p2141_p5), %2515, %v2542_v50  }
 0x61e   : > { %v1630_v56 = vadd.f32 %v1614_v62, %v1491_v18  ;;  %v2274_v7 = vpop.f32.mrb[14].mxu1  ;;  %1785 = vperm.xlu1 (!%p2141_p5), %2516, %v2544_v28   ;;  %v1707_v62 = vld [vmem:[#allocation7 + $0x28] sm:$0xff] (!%p2141_p5)  ;;  %v1712_v29 = vld [vmem:[#allocation7 + $0x50] sm:$0xff] (!%p2141_p5) }
 0x61f   : > { %1648 = vst.msk [vmem:[#allocation7 + $0x70] sm:$0xff] %vm942_vm3, %v1632_v54  ;;  %v1633_v32 = vadd.f32 %v2274_v7, %v1617_v19  ;;  %v1494_v3 = vpop.f32.mrb[15].mxu1  ;;  %v1706_v19 = vld [vmem:[#allocation7 + $0x20] sm:$0xff] (!%p2141_p5) }
 0x620   : > { %1646 = vst.msk [vmem:[#allocation7 + $0x60] sm:$0xff] %vm942_vm3, %v1630_v56  ;;  %v1631_v10 = vadd.f32 %v1615_v22, %v1494_v3  ;;  %v1710_v31 = vld [vmem:[#allocation7 + $0x40] sm:$0xff] (!%p2141_p5)  ;;  %v1713_v61 = vld [vmem:[#allocation7 + $0x58] sm:$0xff] (!%p2141_p5) }
 0x621   : > { %1649 = vst.msk [vmem:[#allocation7 + $0x78] sm:$0xff] %vm942_vm3, %v1633_v32  ;;  %1780 = vperm.xlu0 (!%p2141_p5), %2515, %v2546_v52   ;;  %v1709_v32 = vld [vmem:[#allocation7 + $0x38] sm:$0xff] (!%p2141_p5)  ;;  %v1711_v20 = vld [vmem:[#allocation7 + $0x48] sm:$0xff] (!%p2141_p5) }
 0x622   : > { %1647 = vst.msk [vmem:[#allocation7 + $0x68] sm:$0xff] %vm942_vm3, %v1631_v10  ;;  %1795 = vperm.xlu1 (!%p2141_p5), %2516, %v2548_v23   ;;  %v1708_v10 = vld [vmem:[#allocation7 + $0x30] sm:$0xff] (!%p2141_p5) }
 0x625   : > { %1790 = vperm.xlu0 %2515, %v2550_v59  }
 0x626   : > { %1837 = vperm.xlu1 %2516, %v1827_v1   ;;  %v1716_v23 = vld [vmem:[#allocation7 + $0x70] sm:$0xff] }
 0x627   : > { %v1714_v37 = vld [vmem:[#allocation7 + $0x60] sm:$0xff] }
 0x628   : > { %v1717_v28 = vld [vmem:[#allocation7 + $0x78] sm:$0xff] }
 0x629   : > { %1832 = vperm.xlu0 %2515, %v1826_v33   ;;  %v1715_v15 = vld [vmem:[#allocation7 + $0x68] sm:$0xff] }
 0x62a   : > { %1847 = vperm.xlu1 %2516, %v1829_v26  }
 0x62d   : > { %1842 = vperm.xlu0 %2515, %v1828_v8  }
 0x680   : > { %v1731_v35 = vpop.permute.xlu1 %1730 }
 0x681   : > { %v1800_v40 = vmul.f32 %v1731_v35, %v1704_v58  ;;  %v2518_v35 = vld [vmem:[%s3811_s7 + $0x8] sm:$0xff]  }
 0x688   : > { %v1721_v38 = vpop.permute.xlu0 %1720 }
 0x689   : > { %v1736_v42 = vpop.permute.xlu1 %1735  ;;  %v1798_v0 = vmul.f32 %v1721_v38, %v1702_v39 }
 0x68a   : > { %v1801_v12 = vmul.f32 %v1736_v42, %v1705_v48 }
 0x68c   : > { %v1726_v24 = vpop.permute.xlu0 %1725  ;;  %v1815_v21 = vpack.c.bf16 %v1801_v12, %v1800_v40  ;;  %v1939_v12 = vld [vmem:[%s3083_s2] sm:$0xff] }
 0x68d   : > { %v1799_v25 = vmul.f32 %v1726_v24, %v1703_v13  ;;  %v1746_v2 = vpop.permute.xlu1 %1745  ;;  %v1941_v13 = vld [vmem:[%s3083_s2 + $0x10] sm:$0xff] }
 0x68e   : > { %v1803_v18 = vmul.f32 %v1746_v2, %v1707_v62  ;;  %v1870_v7 = vsel %vm942_vm3, %v1815_v21, 0  ;;  %v1940_v2 = vld [vmem:[%s3083_s2 + $0x8] sm:$0xff] }
 0x68f   : > { %v1814_v43 = vpack.c.bf16 %v1799_v25, %v1798_v0 }
 0x690   : > { %v1741_v54 = vpop.permute.xlu0 %1740 }
 0x691   : > { %2299 = vmatprep.subr.msk.bf16.mxu0 %vm942_vm3, %v1814_v43  ;;  %v1867_v9 = vsel %vm942_vm3, %v1814_v43, 0  ;;  %v1802_v22 = vmul.f32 %v1741_v54, %v1706_v19  ;;  %v1756_v3 = vpop.permute.xlu1 %1755 }
 0x692   : > { %2276 = vmatpush3.bf16.xpose.msra.mxu0 %v1867_v9  ;;  %v1805_v36 = vmul.f32 %v1756_v3, %v1709_v32 }
 0x693   : > { %2300 = vmatprep.subr.msk.bf16.mxu0 %vm942_vm3, %v1815_v21  ;;  %v1816_v56 = vpack.c.bf16 %v1803_v18, %v1802_v22  ;;  %v1942_v21 = vld [vmem:[%s3083_s2 + $0x18] sm:$0xff] }
 0x694   : > { %v1751_v14 = vpop.permute.xlu0 %1750 }
 0x695   : > { %v1804_v46 = vmul.f32 %v1751_v14, %v1708_v10  ;;  %v1873_v4 = vsel %vm942_vm3, %v1816_v56, 0  ;;  %v1766_v63 = vpop.permute.xlu1 %1765 }
 0x696   : > { %v1807_v17 = vmul.f32 %v1766_v63, %v1711_v20 }
 0x697   : > { %v1817_v27 = vpack.c.bf16 %v1805_v36, %v1804_v46 }
 0x698   : > { %v1761_v41 = vpop.permute.xlu0 %1760 }
 0x699   : > { %v1806_v34 = vmul.f32 %v1761_v41, %v1710_v31  ;;  %v1876_v45 = vsel %vm942_vm3, %v1817_v27, 0  ;;  %v1776_v57 = vpop.permute.xlu1 %1775 }
 0x69a   : > { %2278 = vmatpush3.bf16.xpose.msra.mxu0 %v1870_v7  ;;  %v1809_v47 = vmul.f32 %v1776_v57, %v1713_v61 }
 0x69b   : > { %2301 = vmatprep.subr.msk.bf16.mxu0 %vm942_vm3, %v1816_v56  ;;  %v1818_v16 = vpack.c.bf16 %v1807_v17, %v1806_v34 }
 0x69c   : > { %v1771_v11 = vpop.permute.xlu0 %1770 }
 0x69d   : > { %v1808_v5 = vmul.f32 %v1771_v11, %v1712_v29  ;;  %v1879_v49 = vsel %vm942_vm3, %v1818_v16, 0  ;;  %v1786_v44 = vpop.permute.xlu1 %1785 }
 0x69e   : > { %v1811_v51 = vmul.f32 %v1786_v44, %v1715_v15 }
 0x69f   : > { %v1819_v60 = vpack.c.bf16 %v1809_v47, %v1808_v5 }
 0x6a0   : > { %v1781_v6 = vpop.permute.xlu0 %1780 }
 0x6a1   : > { %v1810_v55 = vmul.f32 %v1781_v6, %v1714_v37  ;;  %v1882_v50 = vsel %vm942_vm3, %v1819_v60, 0  ;;  %v1796_v52 = vpop.permute.xlu1 %1795 }
 0x6a2   : > { %2280 = vmatpush3.bf16.xpose.msra.mxu0 %v1873_v4  ;;  %v1813_v1 = vmul.f32 %v1796_v52, %v1717_v28 }
 0x6a3   : > { %2302 = vmatprep.subr.msk.bf16.mxu0 %vm942_vm3, %v1817_v27  ;;  %v1820_v53 = vpack.c.bf16 %v1811_v51, %v1810_v55 }
 0x6a4   : > { %v1791_v59 = vpop.permute.xlu0 %1790 }
 0x6a5   : > { %v1812_v33 = vmul.f32 %v1791_v59, %v1716_v23  ;;  %v1885_v8 = vsel %vm942_vm3, %v1820_v53, 0  ;;  %v1838_v38 = vpop.permute.xlu1 %1837 }
 0x6a7   : > { %v1821_v26 = vpack.c.bf16 %v1813_v1, %v1812_v33 }
 0x6a8   : > { %v1833_v58 = vpop.permute.xlu0 %1832 }
 0x6a9   : > { %v1888_v30 = vsel %vm942_vm3, %v1821_v26, 0  ;;  %v1848_v24 = vpop.permute.xlu1 %1847 }
 0x6aa   : > { %2282 = vmatpush3.bf16.xpose.msra.mxu0 %v1876_v45 }
 0x6ab   : > { %2303 = vmatprep.subr.msk.bf16.mxu0 %vm942_vm3, %v1818_v16 }
 0x6ac   : > { %v1843_v48 = vpop.permute.xlu0 %1842 }
 0x6b2   : > { %2284 = vmatpush3.bf16.xpose.msra.mxu0 %v1879_v49 }
 0x6b3   : > { %2304 = vmatprep.subr.msk.bf16.mxu0 %vm942_vm3, %v1819_v60 }
 0x6ba   : > { %2286 = vmatpush3.bf16.xpose.msra.mxu0 %v1882_v50 }
 0x6bb   : > { %2305 = vmatprep.subr.msk.bf16.mxu0 %vm942_vm3, %v1820_v53 }
 0x6c2   : > { %2288 = vmatpush3.bf16.xpose.msra.mxu0 %v1885_v8 }
 0x6c3   : > { %2306 = vmatprep.subr.msk.bf16.mxu0 %vm942_vm3, %v1821_v26 }
 0x6ca   : > { %2290 = vmatpush3.bf16.xpose.msra.mxu0 %v1888_v30 }
 0x6d1   : > { %2292 = vmatmul.mubr.msk.bf16.vlgmr.msra.gmra.mrb[0].mxu0 %vm942_vm3, %v2518_v35 }
 0x7a4   : > { %v2293_v39 = vpop.f32.mrb[0].mxu0 }
 0x7a5   : > { %v1933_v40 = vadd.f32 %v2293_v39, %v1843_v48  ;;  %v1924_v42 = vpop.f32.mrb[1].mxu0 }
 0x7a6   : > { %v1925_v0 = vadd.f32 %v1924_v42, %v1833_v58  ;;  %v2294_v25 = vpop.f32.mrb[2].mxu0 }
 0x7a7   : > { %v1945_v43 = vadd.f32 %v1941_v13, %v1933_v40  ;;  %v1936_v9 = vadd.f32 %v2294_v25, %v1848_v24  ;;  %v1927_v62 = vpop.f32.mrb[3].mxu0 }
 0x7a8   : > { %v1943_v19 = vadd.f32 %v1939_v12, %v1925_v0  ;;  %v1928_v54 = vadd.f32 %v1927_v62, %v1838_v38 }
 0x7a9   : > { %1949 = vst [vmem:[%s3097_s23 + $0x10] sm:$0xff] %v1945_v43  ;;  %v1946_v18 = vadd.f32 %v1942_v21, %v1936_v9 }
 0x7aa   : > { %1947 = vst [vmem:[%s3097_s23] sm:$0xff] %v1943_v19  ;;  %v1944_v22 = vadd.f32 %v1940_v2, %v1928_v54 }
 0x7ab   : > { %1950 = vst [vmem:[%s3097_s23 + $0x18] sm:$0xff] %v1946_v18 }
 0x7ac   : > { %1948 = vst [vmem:[%s3097_s23 + $0x8] sm:$0xff] %v1944_v22 }
 0x7ad PF: > { %s3812_s28 = sld [smem:[#allocation20_spill]]  ;;  %s3813_s27 = sld [smem:[#allocation19_spill]] }
 0x7ae   : > { %s3814_s13 = sld [smem:[#allocation23_spill]]  ;;  %s1966_s5 = sshll.u32 %s3097_s23, 4  ;;  %s3633_s5 = int_to_ptr.vmem [resolvable:$true] %s1966_s5 }
 0x7af   : > { %s3815_s16 = sld [smem:[#allocation38_spill]]  ;;  %s1952_s1 = scalar_lea.sflag [#allocation10], %s3079_s29 }
 0x7b0   : > { %s2611_s4 = scalar_lea.vmem %s3633_s5, 512 }
 0x7b1   : > { %p2612_p1 = scmp.ne.s32.totalorder %s3633_s5, %s2611_s4 }
 0x7b3   : > { %s2147_s20 = sshll.u32 %s3812_s28, 3  ;;  %s2765_s28 = smov [#allocation13]  }
 0x7b4   : > { %s1963_s21 = sadd.s32 %s3813_s27, %s2147_s20  ;;  %p3817_p3 = scmp.ne.s32.totalorder %s3814_s13, 0 }
 0x7b5   : > { %s2148_s0 = sshll.u32 %s1963_s21, 7  ;;  %s3816_s30 = smov %s3815_s16 }
 0x7b6   : > { %s3638_s22 = scalar_lea.hbm %s3815_s16, %s2148_s0  ;;  %p2613_p6 = pnand %p2612_p1, %p3817_p3 }
 0x7b7   : > { %s2615_s27 = sshll.u32 %s2765_s28, 4  ;;  %s2616_s27 = int_to_ptr.vmem [resolvable:$false] %s2615_s27 }
 0x7b8   : > { %p2614_p8 = pneg %p2613_p6  ;;  %s2617_s23 = scalar_lea.vmem %s2616_s27, 1024 }
 0x7b9   : > { %p2618_p12 = scmp.lt.s32.totalorder %s3633_s5, %s2616_s27  ;;  %p2619_p0 = scmp.lt.s32.totalorder %s2617_s23, %s2611_s4 }
 0x7bb   : > { %p2620_p13 = por %p2619_p0, %p2618_p12 }
 0x7bd   : > { %p2621_p2 = pnand %p2620_p13, %p2614_p8 }
 0x7bf   : > { %2624 = shalt.err (!%p2621_p2)
}
 0x7c0   : > { %s2625_s20 = scalar_lea.hbm %s3638_s22, 512  ;;  %s2629_s2 = scalar_lea.hbm %s3816_s30, 2048 }
 0x7c1   : > { %p2626_p7 = scmp.ne.s32.totalorder %s3638_s22, %s2625_s20  ;;  %p2630_p10 = scmp.lt.u32.totalorder %s3638_s22, %s3816_s30 }
 0x7c2   : > { %p2631_p11 = scmp.lt.u32.totalorder %s2629_s2, %s2625_s20  ;;  %p2633_p1 = scmp.lt.u32.totalorder %s2625_s20, %s3638_s22 }
 0x7c3   : > { %p2627_p4 = pnand %p2626_p7, %p3817_p3 }
 0x7c4   : > { %p2632_p5 = por %p2631_p11, %p2630_p10 }
 0x7c5   : > { %p2628_p9 = pneg %p2627_p4 }
 0x7c6   : > { %p2634_p6 = por %p2633_p1, %p2632_p5 }
 0x7c8   : > { %p2635_p8 = pnand %p2634_p6, %p2628_p9 }
 0x7ca   : > { %2638 = shalt.err (!%p2635_p8)
}
 0x7cb   : > { %s2766_s4 = smov 128   ;;  %s2767_s28 = smov 256  }
 0x7cc   : > { %s2768_s27 = smov 8  }
 0x7cd   : > { %2311 = dma.vmem_to_hbm [thread:$0]  (%p3817_p3), %s3633_s5, 512, %s3638_s22, %s1952_s1, %s2766_s4, %s2767_s28, %s2768_s27  }
 0x7ce PF: > { %s3818_s23 = sld [smem:[#allocation17_spill]]  ;;  %s3819_s21 = sld [smem:[#allocation24_spill]] }
 0x7cf   : > { %p2325_p12 = scmp.ge.s32.totalorder %s2753_s25, 2 }
 0x7d4   : > { %s1981_s0 = sand.u32 1, %s3818_s23   ;;  %p3820_p0 = scmp.ne.s32.totalorder %s3819_s21, 0 }
 0x7d5   : > { %s1982_s20 = scalar_lea.sflag [#allocation10], %s1981_s0 }
 0x7d6   : > { %p2321_p13 = pnand %p2325_p12, %p3820_p0 }
 0x7d8   : > { %2700 = dma.done.wait (!%p2321_p13), %s1982_s20, 512  }
 0x7d9   : > { %2702 = vsyncadd (!%p2321_p13), %s1982_s20, 4294966784  ;;  %s29_s25 = sadd.s32 1, %s2753_s25   ;;  %s3822_s19 = sld [smem:[#allocation21_spill]] }
 0x7da   : > { %p3669_p2 = scmp.ge.s32.totalorder %s29_s25, 10   ;;  %s3823_s20 = sld [smem:[#allocation22_spill]] }
 0x7db   : > { %s3824_s22 = sld [smem:[#allocation25_spill]]  ;;  %s3825_s23 = sld [smem:[#allocation26_spill]] }
 0x7dc   : > { %s3826_s13 = smov %s2709_s14  ;;  %s3827_s14 = smov %s2713_s15 }
 0x7dd   : > { %s3828_s15 = smov %s3028_s3  ;;  %s3829_s16 = smov %s2721_s17 }
 0x7de   : > { %s3830_s17 = smov %s2725_s18  ;;  %s3831_s18 = smov %s3025_s12 }
 0x7df   : > { %s3832_s21 = smov %s2749_s24  ;;  %s3833_s24 = smov %s3843_s9 }
 0x7e0   :  { %28 = sbr.rel (!%p3669_p2) target bundleno = 24 (0x18), region = 134 }
 0x7e7   :  { %1987 = vsyncpa [#allocation9], 1 }
 0x7e8   :  { %1989 = vsyncpa [#allocation9 + $0x1], 1 }
 0x7e9   :  { %1990 = vsyncpa [#allocation12], 1 }
 0x7ea   :  { %1992 = vsyncpa [#allocation12 + $0x1], 1 }
 0x7eb   :  { %1993 = vsyncpa [#allocation10], 1 }
 0x7ec   :  { %1995 = vsyncpa [#allocation10 + $0x1], 1 }

</bundles_post_ra>
